<compile_context>
chip_gen: v6e
topology: v6e:2x2x1
jax: 0.10.0
libtpu: 0.0.40
codegen_flags: <defaults>
</compile_context>

<pallas_src>
import functools
import math

import jax
import jax.numpy as jnp
from jax.experimental import pallas as pl
from jax.experimental.pallas import tpu as pltpu

_LANE_TARGET = 512        # boxes per group on the lane axis (multiple of 256 for v6e/v7x MXU)
_GROUPS_PER_BLOCK = 8     # node groups per grid step -> up to 512 nodes per DMA block


def _group_size(num_bbox):
    """Smallest G with (G * num_bbox) % 128 == 0, scaled up toward _LANE_TARGET lanes."""
    g_base = 128 // math.gcd(128, num_bbox)
    return g_base * max(1, _LANE_TARGET // (g_base * num_bbox))


def _pair_score_kernel(lrow_ref, lnb_ref, v_ref, emb_ref, r_ref, wv_ref, wa_ref,
                       b1_ref, w2_ref, b2_ref, out_ref, *, n_groups):
    """One grid step = n_groups groups of G tree nodes (G*N boxes on the lane axis).

    lrow_ref: (n_groups, 1, G*N)  box logits, (node, box) flattened on lanes
    lnb_ref : (n_groups, N, G)    box logits, boxes on sublanes (per-node max)
    v_ref   : (n_groups, G*N, D)  visual feats, HBM-contiguous layout
    emb_ref : (n_groups, W, G)    word embedding per node (nodes on lanes)
    r_ref   : (G, G*N)            constant 0/1 node->box expansion matrix (resident)
    wv_ref  : (W, D)              W.weight[:, :D]   (resident)
    wa_ref  : (W, D)              W.weight[:, D:]   (resident)
    b1_ref  : (W, 1)              W.bias            (resident)
    w2_ref  : (W, 1)              fc.weight         (resident)
    b2_ref  : (1,)     SMEM       fc.bias
    out_ref : (n_groups, 1, G*N)  lane-dense scores
    """
    b2 = b2_ref[0]

    def group_body(g, carry):
        r = r_ref[...]                                                      # (G, GN)
        v_g = v_ref[g]                                                      # (GN, D)
        l_row = lrow_ref[g]                                                 # (1, GN)
        l_nb = lnb_ref[g]                                                   # (N, G)
        emb_g = emb_ref[g]                                                  # (W, G)

        # --- per-node softmax over the N boxes (stabilised with the per-node max) ---
        m_node = jnp.max(l_nb, axis=0, keepdims=True)                       # (1, G)
        m_box = jnp.dot(m_node, r, preferred_element_type=jnp.float32)      # (1, GN)
        e_row = jnp.exp(l_row - m_box)                                      # (1, GN)
        pe = r * e_row                                                      # (G, GN)
        denom = jnp.sum(pe, axis=1, keepdims=True)                          # (G, 1)

        # --- attended feature per node: segmented sum over each node's boxes on MXU ---
        att = jnp.dot(pe, v_g, preferred_element_type=jnp.float32) / denom  # (G, D)

        # --- per-node half of the linear layer, expanded node->box via R ---
        c = jnp.dot(wa_ref[...], att.T,
                    preferred_element_type=jnp.float32) + b1_ref[...]       # (W, G)
        c_box = jnp.dot(c, r, preferred_element_type=jnp.float32)           # (W, GN)
        emb_box = jnp.dot(emb_g, r, preferred_element_type=jnp.float32)     # (W, GN)

        # --- per-box half: lane-flattened MXU matmul over all G*N boxes at once ---
        main = jnp.dot(wv_ref[...], v_g.T,
                       preferred_element_type=jnp.float32)                  # (W, GN)
        prod = (main + c_box) * emb_box                                     # (W, GN)

        # --- fc is linear: defer the L2 normalisation past it ---
        s = jnp.sum(prod * w2_ref[...], axis=0, keepdims=True)              # (1, GN)
        n2 = jnp.sum(prod * prod, axis=0, keepdims=True)                    # (1, GN)
        inv_norm = jax.lax.rsqrt(jnp.maximum(n2, 1e-24))                    # == 1/max(||.||, 1e-12)
        out_ref[g] = s * inv_norm + b2                                      # lane-dense store
        return carry

    jax.lax.fori_loop(0, n_groups, group_body, 0)


def prepare_params(params, num_bbox):
    """Hoist weight-layout work and the constant expansion matrix out of the hot path."""
    w_w = params["W_w"].astype(jnp.float32)                    # (W, 2D), as stored by nn.Linear
    word_size, two_d = w_w.shape
    d = two_d // 2
    g = _group_size(num_bbox)
    gn = g * num_bbox
    # R[b, b*N + n] = 1 : node -> box expansion / segment-sum operator (128 KiB at G=64, N=8).
    r = (jnp.arange(gn)[None, :] // num_bbox == jnp.arange(g)[:, None]).astype(jnp.float32)
    return {
        "W_v": w_w[:, :d],
        "W_a": w_w[:, d:],
        "b1": params["W_b"].reshape(word_size, 1).astype(jnp.float32),
        "w2": params["fc_w"].reshape(word_size, 1).astype(jnp.float32),
        "b2": params["fc_b"].reshape(1).astype(jnp.float32),
        "R": r,
        "G": g,
    }


def pair_score_batched(visual_feats, in_logits, embeddings, prepared):
    """Batched PairScore over many tree nodes in one blocked, gridded pallas_call.

    visual_feats: (B, N, D) f32, in_logits: (B, N) f32, embeddings: (B, W) f32
    returns:      (B, N) f32
    """
    b, n, d = visual_feats.shape
    w = embeddings.shape[1]
    g = prepared["G"]
    gn = g * n
    n_groups = min(_GROUPS_PER_BLOCK, pl.cdiv(b, g))
    tb = g * n_groups                                 # nodes per grid step
    b_pad = pl.cdiv(b, tb) * tb
    num_blocks = b_pad // tb
    bg = b_pad // g

    v = visual_feats.astype(jnp.float32)
    lg = in_logits.astype(jnp.float32)
    em = embeddings.astype(jnp.float32)
    if b_pad != b:
        pad = b_pad - b
        v = jnp.pad(v, ((0, pad), (0, 0), (0, 0)))    # zero-padded nodes are safe & sliced off
        lg = jnp.pad(lg, ((0, pad), (0, 0)))
        em = jnp.pad(em, ((0, pad), (0, 0)))

    # Only free reshapes on the big visual tensor (no wrapper-side HBM transpose);
    # the tiny logits / embedding tensors are re-laid out wrapper-side.
    v_arr = v.reshape(bg, gn, d)
    lrow_arr = lg.reshape(bg, 1, gn)
    lnb_arr = lg.reshape(bg, g, n).transpose(0, 2, 1)     # (BG, N, G)
    emb_arr = em.reshape(bg, g, w).transpose(0, 2, 1)     # (BG, W, G)

    out = pl.pallas_call(
        functools.partial(_pair_score_kernel, n_groups=n_groups),
        out_shape=jax.ShapeDtypeStruct((bg, 1, gn), jnp.float32),
        grid=(num_blocks,),
        in_specs=[
            pl.BlockSpec((n_groups, 1, gn), lambda i: (i, 0, 0)),
            pl.BlockSpec((n_groups, n, g), lambda i: (i, 0, 0)),
            pl.BlockSpec((n_groups, gn, d), lambda i: (i, 0, 0)),
            pl.BlockSpec((n_groups, w, g), lambda i: (i, 0, 0)),
            # shared weights / constants: same block every step -> stay resident in VMEM
            pl.BlockSpec((g, gn), lambda i: (0, 0)),
            pl.BlockSpec((w, d), lambda i: (0, 0)),
            pl.BlockSpec((w, d), lambda i: (0, 0)),
            pl.BlockSpec((w, 1), lambda i: (0, 0)),
            pl.BlockSpec((w, 1), lambda i: (0, 0)),
            pl.BlockSpec(memory_space=pltpu.MemorySpace.SMEM),
        ],
        out_specs=pl.BlockSpec((n_groups, 1, gn), lambda i: (i, 0, 0)),
        compiler_params=pltpu.CompilerParams(dimension_semantics=("parallel",)),
    )(lrow_arr, lnb_arr, v_arr, emb_arr, prepared["R"], prepared["W_v"],
      prepared["W_a"], prepared["b1"], prepared["w2"], prepared["b2"])
    return out.reshape(b_pad, n)[:b]


def pair_score(visual_feats, in_logits, embedding, prepared):
    """Single-node PairScore.forward (PyTorch-equivalent), returns (N,)."""
    out = pair_score_batched(visual_feats[None], in_logits[None],
                             embedding[None], prepared)
    return out[0]


def init_params(key, vis_dim, word_size):
    """Deterministic synthetic init matching nn.Linear shapes."""
    k1, k2, k3, k4 = jax.random.split(key, 4)
    bound1 = 1.0 / jnp.sqrt(2.0 * vis_dim)
    bound2 = 1.0 / jnp.sqrt(float(word_size))
    return {
        "W_w": jax.random.uniform(k1, (word_size, 2 * vis_dim),
                                  minval=-bound1, maxval=bound1, dtype=jnp.float32),
        "W_b": jax.random.uniform(k2, (word_size,),
                                  minval=-bound1, maxval=bound1, dtype=jnp.float32),
        "fc_w": jax.random.uniform(k3, (1, word_size),
                                   minval=-bound2, maxval=bound2, dtype=jnp.float32),
        "fc_b": jax.random.uniform(k4, (1,),
                                   minval=-bound2, maxval=bound2, dtype=jnp.float32),
    }


def _reference(visual_feats, in_logits, embedding, params):
    """Pure-JAX reference mirroring the PyTorch forward."""
    p = jax.nn.softmax(in_logits, axis=0)
    att = p[None, :] @ visual_feats                              # (1, D)
    att_rep = jnp.broadcast_to(att, visual_feats.shape)          # (N, D)
    x = jnp.concatenate([visual_feats, att_rep], axis=1)         # (N, 2D)
    mapped = x @ params["W_w"].T + params["W_b"]                 # (N, W)
    prod = mapped * embedding[None, :]
    norm = jnp.sqrt(jnp.sum(prod * prod, axis=1, keepdims=True))
    out = prod / jnp.maximum(norm, 1e-12)
    return (out @ params["fc_w"].T + params["fc_b"])[:, 0]


if __name__ == "__main__":
    num_bbox, vis_dim, word_size = 8, 16, 32

    key = jax.random.PRNGKey(0)
    kv, kl, ke, kp, kb = jax.random.split(key, 5)
    visual_feats = jax.random.normal(kv, (num_bbox, vis_dim), dtype=jnp.float32)
    in_logits = jax.random.normal(kl, (num_bbox,), dtype=jnp.float32)
    embedding = jax.random.normal(ke, (word_size,), dtype=jnp.float32)
    params = init_params(kp, vis_dim, word_size)
    prepared = prepare_params(params, num_bbox)   # hoisted weight layout + R (done once)

    # single-node forward (matches PairScore.forward)
    out = pair_score(visual_feats, in_logits, embedding, prepared)
    jax.block_until_ready(out)
    ref = _reference(visual_feats, in_logits, embedding, params)
    assert out.shape == (num_bbox,)
    assert jnp.allclose(out, ref, atol=5e-5, rtol=5e-5), (out, ref)

    ref_batched = jax.vmap(_reference, in_axes=(0, 0, 0, None))

    # small batch of "tree nodes" through one blocked pallas_call
    kb1, kb2, kb3, kb4, kb5, kb6 = jax.random.split(kb, 6)
    B = 4
    vb = jax.random.normal(kb1, (B, num_bbox, vis_dim), dtype=jnp.float32)
    lb = jax.random.normal(kb2, (B, num_bbox), dtype=jnp.float32)
    eb = jax.random.normal(kb3, (B, word_size), dtype=jnp.float32)
    outb = pair_score_batched(vb, lb, eb, prepared)
    jax.block_until_ready(outb)
    assert outb.shape == (B, num_bbox)
    assert jnp.allclose(outb, ref_batched(vb, lb, eb, params), atol=5e-5, rtol=5e-5)

    # larger batch: exercises multi-group blocks, multiple grid steps and node padding
    B2 = 600
    vb2 = jax.random.normal(kb4, (B2, num_bbox, vis_dim), dtype=jnp.float32)
    lb2 = jax.random.normal(kb5, (B2, num_bbox), dtype=jnp.float32)
    eb2 = jax.random.normal(kb6, (B2, word_size), dtype=jnp.float32)
    outb2 = pair_score_batched(vb2, lb2, eb2, prepared)
    jax.block_until_ready(outb2)
    assert outb2.shape == (B2, num_bbox)
    assert jnp.allclose(outb2, ref_batched(vb2, lb2, eb2, params), atol=5e-5, rtol=5e-5)

    print("KERNEL_OK")
</pallas_src>

<mosaic_0001>
module attributes {stable_mosaic.version = 11 : i64} {
  func.func @_pair_score_kernel(%arg0: i32, %arg1: memref<1x1x512xf32, #tpu.memory_space<vmem>>, %arg2: memref<1x8x64xf32, #tpu.memory_space<vmem>>, %arg3: memref<1x512x16xf32, #tpu.memory_space<vmem>>, %arg4: memref<1x32x64xf32, #tpu.memory_space<vmem>>, %arg5: memref<64x512xf32, #tpu.memory_space<vmem>>, %arg6: memref<32x16xf32, #tpu.memory_space<vmem>>, %arg7: memref<32x16xf32, #tpu.memory_space<vmem>>, %arg8: memref<32x1xf32, #tpu.memory_space<vmem>>, %arg9: memref<32x1xf32, #tpu.memory_space<vmem>>, %arg10: memref<1xf32, #tpu.memory_space<smem>>, %arg11: memref<1x1x512xf32, #tpu.memory_space<vmem>>) attributes {dimension_semantics = [#tpu.dimension_semantics<parallel>], iteration_bounds = array<i64: 1>, scalar_prefetch = 0 : i64, scratch_operands = 0 : i64, tpu.core_type = #tpu.core_type<tc>, window_params = [{transform_indices = @transform_0, window_bounds = array<i64: 1, 1, 512>}, {transform_indices = @transform_1, window_bounds = array<i64: 1, 8, 64>}, {transform_indices = @transform_2, window_bounds = array<i64: 1, 512, 16>}, {transform_indices = @transform_3, window_bounds = array<i64: 1, 32, 64>}, {pipeline_mode = #tpu.pipeline_mode<synchronous>, transform_indices = @transform_4, window_bounds = array<i64: 64, 512>}, {pipeline_mode = #tpu.pipeline_mode<synchronous>, transform_indices = @transform_5, window_bounds = array<i64: 32, 16>}, {pipeline_mode = #tpu.pipeline_mode<synchronous>, transform_indices = @transform_6, window_bounds = array<i64: 32, 16>}, {pipeline_mode = #tpu.pipeline_mode<synchronous>, transform_indices = @transform_7, window_bounds = array<i64: 32, 1>}, {pipeline_mode = #tpu.pipeline_mode<synchronous>, transform_indices = @transform_8, window_bounds = array<i64: 32, 1>}, {transform_indices = @transform_9, window_bounds = array<i64: 1>}, {transform_indices = @transform_10, window_bounds = array<i64: 1, 1, 512>}]} {
    %c0 = arith.constant 0 : index
    %0 = memref.load %arg10[%c0] : memref<1xf32, #tpu.memory_space<smem>>
    %c0_i32 = arith.constant 0 : i32
    %c0_0 = arith.constant 0 : index
    %c0_1 = arith.constant 0 : index
    %1 = vector.load %arg5[%c0_0, %c0_1] : memref<64x512xf32, #tpu.memory_space<vmem>>, vector<64x512xf32>
    %2 = arith.index_cast %c0_i32 : i32 to index
    %c0_2 = arith.constant 0 : index
    %c0_3 = arith.constant 0 : index
    %3 = vector.load %arg3[%2, %c0_2, %c0_3] : memref<1x512x16xf32, #tpu.memory_space<vmem>>, vector<1x512x16xf32>
    %4 = vector.shape_cast %3 : vector<1x512x16xf32> to vector<512x16xf32>
    %5 = arith.index_cast %c0_i32 : i32 to index
    %c0_4 = arith.constant 0 : index
    %c0_5 = arith.constant 0 : index
    %6 = vector.load %arg1[%5, %c0_4, %c0_5] : memref<1x1x512xf32, #tpu.memory_space<vmem>>, vector<1x1x512xf32>
    %7 = vector.shape_cast %6 : vector<1x1x512xf32> to vector<1x512xf32>
    %8 = arith.index_cast %c0_i32 : i32 to index
    %c0_6 = arith.constant 0 : index
    %c0_7 = arith.constant 0 : index
    %9 = vector.load %arg2[%8, %c0_6, %c0_7] : memref<1x8x64xf32, #tpu.memory_space<vmem>>, vector<1x8x64xf32>
    %10 = vector.shape_cast %9 : vector<1x8x64xf32> to vector<8x64xf32>
    %11 = arith.index_cast %c0_i32 : i32 to index
    %c0_8 = arith.constant 0 : index
    %c0_9 = arith.constant 0 : index
    %12 = vector.load %arg4[%11, %c0_8, %c0_9] : memref<1x32x64xf32, #tpu.memory_space<vmem>>, vector<1x32x64xf32>
    %13 = vector.shape_cast %12 : vector<1x32x64xf32> to vector<32x64xf32>
    %cst = arith.constant dense<0xFF800000> : vector<64xf32>
    %14 = vector.multi_reduction <maximumf>, %10, %cst [0] : vector<8x64xf32> to vector<64xf32>
    %15 = vector.shape_cast %14 : vector<64xf32> to vector<1x64xf32>
    %cst_10 = arith.constant dense<0.000000e+00> : vector<1x512xf32>
    %16 = tpu.matmul %15, %1, %cst_10 {dimension_numbers = #tpu.dot_dimension_numbers<[1], [0], [0], [1], [0, 0, 1, 1], [], []>} : vector<1x64xf32>, vector<64x512xf32>, vector<1x512xf32> -> vector<1x512xf32>
    %17 = arith.subf %7, %16 : vector<1x512xf32>
    %18 = math.exp %17 : vector<1x512xf32>
    %19 = vector.broadcast %18 : vector<1x512xf32> to vector<64x512xf32>
    %20 = arith.mulf %1, %19 : vector<64x512xf32>
    %cst_11 = arith.constant dense<0.000000e+00> : vector<64xf32>
    %21 = vector.multi_reduction <add>, %20, %cst_11 [1] : vector<64x512xf32> to vector<64xf32>
    %22 = vector.shape_cast %21 : vector<64xf32> to vector<64x1xf32>
    %cst_12 = arith.constant dense<0.000000e+00> : vector<64x16xf32>
    %23 = tpu.matmul %20, %4, %cst_12 {dimension_numbers = #tpu.dot_dimension_numbers<[1], [0], [0], [1], [0, 0, 1, 1], [], []>} : vector<64x512xf32>, vector<512x16xf32>, vector<64x16xf32> -> vector<64x16xf32>
    %24 = vector.broadcast %22 : vector<64x1xf32> to vector<64x16xf32>
    %25 = arith.divf %23, %24 : vector<64x16xf32>
    %c0_13 = arith.constant 0 : index
    %c0_14 = arith.constant 0 : index
    %26 = vector.load %arg7[%c0_13, %c0_14] : memref<32x16xf32, #tpu.memory_space<vmem>>, vector<32x16xf32>
    %27 = tpu.transpose %25, [1, 0] : vector<64x16xf32> -> vector<16x64xf32>
    %cst_15 = arith.constant dense<0.000000e+00> : vector<32x64xf32>
    %28 = tpu.matmul %26, %27, %cst_15 {dimension_numbers = #tpu.dot_dimension_numbers<[1], [0], [0], [1], [0, 0, 1, 1], [], []>} : vector<32x16xf32>, vector<16x64xf32>, vector<32x64xf32> -> vector<32x64xf32>
    %c0_16 = arith.constant 0 : index
    %c0_17 = arith.constant 0 : index
    %29 = vector.load %arg8[%c0_16, %c0_17] : memref<32x1xf32, #tpu.memory_space<vmem>>, vector<32x1xf32>
    %30 = vector.broadcast %29 : vector<32x1xf32> to vector<32x64xf32>
    %31 = arith.addf %28, %30 : vector<32x64xf32>
    %cst_18 = arith.constant dense<0.000000e+00> : vector<32x512xf32>
    %32 = tpu.matmul %31, %1, %cst_18 {dimension_numbers = #tpu.dot_dimension_numbers<[1], [0], [0], [1], [0, 0, 1, 1], [], []>} : vector<32x64xf32>, vector<64x512xf32>, vector<32x512xf32> -> vector<32x512xf32>
    %cst_19 = arith.constant dense<0.000000e+00> : vector<32x512xf32>
    %33 = tpu.matmul %13, %1, %cst_19 {dimension_numbers = #tpu.dot_dimension_numbers<[1], [0], [0], [1], [0, 0, 1, 1], [], []>} : vector<32x64xf32>, vector<64x512xf32>, vector<32x512xf32> -> vector<32x512xf32>
    %c0_20 = arith.constant 0 : index
    %c0_21 = arith.constant 0 : index
    %34 = vector.load %arg6[%c0_20, %c0_21] : memref<32x16xf32, #tpu.memory_space<vmem>>, vector<32x16xf32>
    %35 = tpu.transpose %4, [1, 0] : vector<512x16xf32> -> vector<16x512xf32>
    %cst_22 = arith.constant dense<0.000000e+00> : vector<32x512xf32>
    %36 = tpu.matmul %34, %35, %cst_22 {dimension_numbers = #tpu.dot_dimension_numbers<[1], [0], [0], [1], [0, 0, 1, 1], [], []>} : vector<32x16xf32>, vector<16x512xf32>, vector<32x512xf32> -> vector<32x512xf32>
    %37 = arith.addf %36, %32 : vector<32x512xf32>
    %38 = arith.mulf %37, %33 : vector<32x512xf32>
    %c0_23 = arith.constant 0 : index
    %c0_24 = arith.constant 0 : index
    %39 = vector.load %arg9[%c0_23, %c0_24] : memref<32x1xf32, #tpu.memory_space<vmem>>, vector<32x1xf32>
    %40 = vector.broadcast %39 : vector<32x1xf32> to vector<32x512xf32>
    %41 = arith.mulf %38, %40 : vector<32x512xf32>
    %cst_25 = arith.constant dense<0.000000e+00> : vector<512xf32>
    %42 = vector.multi_reduction <add>, %41, %cst_25 [0] : vector<32x512xf32> to vector<512xf32>
    %43 = vector.shape_cast %42 : vector<512xf32> to vector<1x512xf32>
    %44 = arith.mulf %38, %38 : vector<32x512xf32>
    %cst_26 = arith.constant dense<0.000000e+00> : vector<512xf32>
    %45 = vector.multi_reduction <add>, %44, %cst_26 [0] : vector<32x512xf32> to vector<512xf32>
    %46 = vector.shape_cast %45 : vector<512xf32> to vector<1x512xf32>
    %cst_27 = arith.constant 1.000000e-24 : f32
    %47 = vector.broadcast %cst_27 : f32 to vector<1x512xf32>
    %48 = arith.maximumf %46, %47 : vector<1x512xf32>
    %49 = math.rsqrt %48 : vector<1x512xf32>
    %50 = arith.mulf %43, %49 : vector<1x512xf32>
    %51 = vector.broadcast %0 : f32 to vector<1x512xf32>
    %52 = arith.addf %50, %51 : vector<1x512xf32>
    %53 = arith.index_cast %c0_i32 : i32 to index
    %c0_28 = arith.constant 0 : index
    %c0_29 = arith.constant 0 : index
    %54 = vector.load %arg11[%53, %c0_28, %c0_29] : memref<1x1x512xf32, #tpu.memory_space<vmem>>, vector<1x1x512xf32>
    %55 = vector.shape_cast %54 : vector<1x1x512xf32> to vector<1x512xf32>
    %56 = vector.shape_cast %52 : vector<1x512xf32> to vector<1x1x512xf32>
    tpu.vector_store %arg11[%53, %c0_28, %c0_29], %56 {strides = array<i32>} : memref<1x1x512xf32, #tpu.memory_space<vmem>>, vector<1x1x512xf32>,
    %c1_i32 = arith.constant 1 : i32
    return
  }
  func.func @transform_0(%arg0: i32) -> (i32, i32, i32) {
    %c0_i32 = arith.constant 0 : i32
    %c0_i32_0 = arith.constant 0 : i32
    %c0_i32_1 = arith.constant 0 : i32
    return %arg0, %c0_i32, %c0_i32_0 : i32, i32, i32
  }
  func.func @transform_1(%arg0: i32) -> (i32, i32, i32) {
    %c0_i32 = arith.constant 0 : i32
    %c0_i32_0 = arith.constant 0 : i32
    %c0_i32_1 = arith.constant 0 : i32
    return %arg0, %c0_i32, %c0_i32_0 : i32, i32, i32
  }
  func.func @transform_2(%arg0: i32) -> (i32, i32, i32) {
    %c0_i32 = arith.constant 0 : i32
    %c0_i32_0 = arith.constant 0 : i32
    %c0_i32_1 = arith.constant 0 : i32
    return %arg0, %c0_i32, %c0_i32_0 : i32, i32, i32
  }
  func.func @transform_3(%arg0: i32) -> (i32, i32, i32) {
    %c0_i32 = arith.constant 0 : i32
    %c0_i32_0 = arith.constant 0 : i32
    %c0_i32_1 = arith.constant 0 : i32
    return %arg0, %c0_i32, %c0_i32_0 : i32, i32, i32
  }
  func.func @transform_4(%arg0: i32) -> (i32, i32) {
    %c0_i32 = arith.constant 0 : i32
    %c0_i32_0 = arith.constant 0 : i32
    %c0_i32_1 = arith.constant 0 : i32
    return %c0_i32, %c0_i32_0 : i32, i32
  }
  func.func @transform_5(%arg0: i32) -> (i32, i32) {
    %c0_i32 = arith.constant 0 : i32
    %c0_i32_0 = arith.constant 0 : i32
    %c0_i32_1 = arith.constant 0 : i32
    return %c0_i32, %c0_i32_0 : i32, i32
  }
  func.func @transform_6(%arg0: i32) -> (i32, i32) {
    %c0_i32 = arith.constant 0 : i32
    %c0_i32_0 = arith.constant 0 : i32
    %c0_i32_1 = arith.constant 0 : i32
    return %c0_i32, %c0_i32_0 : i32, i32
  }
  func.func @transform_7(%arg0: i32) -> (i32, i32) {
    %c0_i32 = arith.constant 0 : i32
    %c0_i32_0 = arith.constant 0 : i32
    %c0_i32_1 = arith.constant 0 : i32
    return %c0_i32, %c0_i32_0 : i32, i32
  }
  func.func @transform_8(%arg0: i32) -> (i32, i32) {
    %c0_i32 = arith.constant 0 : i32
    %c0_i32_0 = arith.constant 0 : i32
    %c0_i32_1 = arith.constant 0 : i32
    return %c0_i32, %c0_i32_0 : i32, i32
  }
  func.func @transform_9(%arg0: i32) -> i32 {
    %c0_i32 = arith.constant 0 : i32
    %c0_i32_0 = arith.constant 0 : i32
    return %c0_i32 : i32
  }
  func.func @transform_10(%arg0: i32) -> (i32, i32, i32) {
    %c0_i32 = arith.constant 0 : i32
    %c0_i32_0 = arith.constant 0 : i32
    %c0_i32_1 = arith.constant 0 : i32
    return %arg0, %c0_i32, %c0_i32_0 : i32, i32, i32
  }
}

</mosaic_0001>

<bundles_post_ra>
// kernel: tpu_custom_call.1
= control target key start
LH: loop header
LB: loop body
LE: loop exit
PB: predicated region body
PF: predicated region fallthrough
CT: control target
= control target key end

     0   :  { %vm140_vm0 = vcmask 523264   ;;  %s3301_s0 = inlined_call_operand.vmem [shape: f32[1,1,512], index: 0, kind: input, shape index: {}]   ;;  %s3302_s1 = inlined_call_operand.vmem [shape: f32[1,8,64], index: 1, kind: input, shape index: {}]   ;;  %s3303_s2 = inlined_call_operand.vmem [shape: f32[1,512,16], index: 2, kind: input, shape index: {}]   ;;  %s3304_s3 = inlined_call_operand.vmem [shape: f32[1,32,64], index: 3, kind: input, shape index: {}]   ;;  %s3305_s4 = inlined_call_operand.vmem [shape: f32[64,512], index: 4, kind: input, shape index: {}]   ;;  %s3306_s5 = inlined_call_operand.vmem [shape: f32[32,16], index: 5, kind: input, shape index: {}]   ;;  %s3307_s6 = inlined_call_operand.vmem [shape: f32[32,16], index: 6, kind: input, shape index: {}]   ;;  %s3308_s7 = inlined_call_operand.vmem [shape: f32[32,1], index: 7, kind: input, shape index: {}]   ;;  %s3309_s8 = inlined_call_operand.vmem [shape: f32[32,1], index: 8, kind: input, shape index: {}]   ;;  %s3310_s9 = inlined_call_operand.<no memory space> [shape: f32[1], index: 9, kind: input, shape index: {}]   ;;  %s3311_s10 = inlined_call_operand.hbm [shape: f32[1,1,512], index: 10, kind: output, shape index: {}]  }
   0x1   :  { %v2213_v0 = vld [vmem:[%s3305_s4 + $0xe8] sm:$0xff]  ;;  %v2218_v1 = vld [vmem:[%s3305_s4 + $0xf8] sm:$0xff]  ;;  %v2223_v2 = vld [vmem:[%s3305_s4 + $0xe0] sm:$0xff] }
   0x2   :  { %3408 = vst [vmem:[#allocation6_spill] sm:$0xff] %v2223_v2  ;;  %167 = vmatprep.subr.mxu0 %v2213_v0  ;;  %238 = vmatprep.subr.mxu1 %v2218_v1  ;;  %v2230_v3 = vld [vmem:[%s3305_s4 + $0xf0] sm:$0xff]  ;;  %v2235_v4 = vld [vmem:[%s3305_s4 + $0xc8] sm:$0xff]  ;;  %v2240_v5 = vld [vmem:[%s3305_s4 + $0xd8] sm:$0xff] }
   0x3   :  { %3409 = vst [vmem:[#allocation7_spill] sm:$0xff] %v2235_v4  ;;  %168 = vmatpush1.msra.mxu0 %v2223_v2  ;;  %239 = vmatpush1.msra.mxu1 %v2230_v3  ;;  %v2247_v6 = vld [vmem:[%s3305_s4 + $0xc0] sm:$0xff]  ;;  %v2252_v7 = vld [vmem:[%s3305_s4 + $0xd0] sm:$0xff]  ;;  %v2257_v8 = vld [vmem:[%s3305_s4 + $0xa8] sm:$0xff] }
   0x4   :  { %3410 = vst [vmem:[#allocation8_spill] sm:$0xff] %v2247_v6  ;;  %169 = vmatprep.subr.mxu0 %v2235_v4  ;;  %240 = vmatprep.subr.mxu1 %v2240_v5  ;;  %v2264_v9 = vld [vmem:[%s3305_s4 + $0xb8] sm:$0xff]  ;;  %v2269_v10 = vld [vmem:[%s3305_s4 + $0xa0] sm:$0xff]  ;;  %v2274_v11 = vld [vmem:[%s3305_s4 + $0xb0] sm:$0xff] }
   0x5   :  { %3411 = vst [vmem:[#allocation9_spill] sm:$0xff] %v2264_v9  ;;  %3412 = vst [vmem:[#allocation10_spill] sm:$0xff] %v2274_v11  ;;  %170 = vmatpush1.msra.mxu0 %v2247_v6  ;;  %241 = vmatpush1.msra.mxu1 %v2252_v7  ;;  %v2281_v12 = vld [vmem:[%s3305_s4 + $0x88] sm:$0xff]  ;;  %v2286_v13 = vld [vmem:[%s3305_s4 + $0x98] sm:$0xff] }
   0x6   :  { %171 = vmatprep.subr.mxu0 %v2257_v8  ;;  %242 = vmatprep.subr.mxu1 %v2264_v9  ;;  %v2293_v14 = vld [vmem:[%s3305_s4 + $0x80] sm:$0xff]  ;;  %v2298_v15 = vld [vmem:[%s3305_s4 + $0x90] sm:$0xff]  ;;  %v2305_v16 = vld [vmem:[%s3305_s4 + $0x68] sm:$0xff] }
   0x7   :  { %3413 = vst [vmem:[#allocation11_spill] sm:$0xff] %v2298_v15  ;;  %172 = vmatpush1.msra.mxu0 %v2269_v10  ;;  %243 = vmatpush1.msra.mxu1 %v2274_v11  ;;  %v2310_v17 = vld [vmem:[%s3305_s4 + $0x78] sm:$0xff]  ;;  %v2317_v18 = vld [vmem:[%s3305_s4 + $0x60] sm:$0xff]  ;;  %v2322_v19 = vld [vmem:[%s3305_s4 + $0x70] sm:$0xff] }
   0x8   :  { %3414 = vst [vmem:[#allocation12_spill] sm:$0xff] %v2310_v17  ;;  %173 = vmatprep.subr.mxu0 %v2281_v12  ;;  %244 = vmatprep.subr.mxu1 %v2286_v13  ;;  %v2329_v20 = vld [vmem:[%s3305_s4 + $0x48] sm:$0xff]  ;;  %v2334_v21 = vld [vmem:[%s3305_s4 + $0x58] sm:$0xff]  ;;  %v2341_v22 = vld [vmem:[%s3305_s4 + $0x40] sm:$0xff] }
   0x9   :  { %174 = vmatpush1.msra.mxu0 %v2293_v14  ;;  %245 = vmatpush1.msra.mxu1 %v2298_v15  ;;  %3415 = vst [vmem:[#allocation13_spill] sm:$0xff] %v2334_v21  ;;  %v2346_v23 = vld [vmem:[%s3305_s4 + $0x50] sm:$0xff]  ;;  %v2353_v24 = vld [vmem:[%s3305_s4 + $0x28] sm:$0xff]  ;;  %v2358_v25 = vld [vmem:[%s3305_s4 + $0x38] sm:$0xff] }
   0xa   :  { %175 = vmatprep.subr.mxu0 %v2305_v16  ;;  %246 = vmatprep.subr.mxu1 %v2310_v17  ;;  %3416 = vst [vmem:[#allocation14_spill] sm:$0xff] %v2346_v23  ;;  %3417 = vst [vmem:[#allocation15_spill] sm:$0xff] %v2353_v24  ;;  %v135_v26 = vld [vmem:[%s3302_s1] sm:$0xff]  ;;  %v2373_v28 = vld [vmem:[%s3305_s4 + $0x30] sm:$0xff] }
   0xb   :  { %176 = vmatpush1.msra.mxu0 %v2317_v18  ;;  %247 = vmatpush1.msra.mxu1 %v2322_v19  ;;  %3418 = vst [vmem:[#allocation16_spill] sm:$0xff] %v2358_v25  ;;  %v2368_v27 = vld [vmem:[%s3305_s4 + $0x20] sm:$0xff]  ;;  %3420 = vst [vmem:[#allocation18_spill] sm:$0xff] %v2373_v28  ;;  %v141_v29 = vsel %vm140_vm0, %v135_v26, -inf }
   0xc   :  { %177 = vmatprep.subr.mxu0 %v2329_v20  ;;  %248 = vmatprep.subr.mxu1 %v2334_v21  ;;  %3419 = vst [vmem:[#allocation17_spill] sm:$0xff] %v2368_v27 }
   0xd   :  { %16 = vsyncpa [#allocation4], 0  ;;  %178 = vmatpush1.msra.mxu0 %v2341_v22  ;;  %249 = vmatpush1.msra.mxu1 %v2346_v23  ;;  %v2381_v30 = vld [vmem:[%s3305_s4 + $0x8] sm:$0xff]  ;;  %v2386_v31 = vld [vmem:[%s3305_s4 + $0x18] sm:$0xff]  ;;  %v142_v32 = vrot.slane %v141_v29, 4  ;;  %v3312_v36 = vmov 0.0  }
   0xe   :  { %3421 = vst [vmem:[#allocation19_spill] sm:$0xff] %v2381_v30  ;;  %3422 = vst [vmem:[#allocation20_spill] sm:$0xff] %v2386_v31  ;;  %179 = vmatprep.subr.mxu0 %v2353_v24  ;;  %250 = vmatprep.subr.mxu1 %v2358_v25  ;;  %v2393_v33 = vld [vmem:[%s3305_s4] sm:$0xff]  ;;  %v2400_v34 = vld [vmem:[%s3305_s4 + $0x10] sm:$0xff]  ;;  %vm672_vm1 = vcmask 130048   ;;  %s2154_s26 = smov [#allocation3]  }
   0xf   :  { %3423 = vst [vmem:[#allocation21_spill] sm:$0xff] %v2393_v33  ;;  %180 = vmatpush1.msra.mxu0 %v2368_v27  ;;  %251 = vmatpush1.msra.mxu1 %v2373_v28  ;;  %3424 = vst [vmem:[#allocation22_spill] sm:$0xff] %v2400_v34  ;;  %v143_v35 = vmax.f32 %v141_v29, %v142_v32  ;;  %v2413_v41 = vld [vmem:[%s3303_s2 + $0xf8] sm:$0xff]  ;;  %v2437_v45 = vld [vmem:[%s3303_s2 + $0xf0] sm:$0xff]  ;;  %s1761_s27 = sshll.u32 %s2154_s26, 4  ;;  %s1762_s27 = int_to_ptr.vmem [resolvable:$true] %s1761_s27 }
  0x10   :  { %181 = vmatprep.subr.mxu0 %v2381_v30  ;;  %252 = vmatprep.subr.mxu1 %v2386_v31  ;;  %3425 = vst [vmem:[#allocation23_spill] sm:$0xff] %v2413_v41  ;;  %v2418_v42 = vld [vmem:[%s3303_s2 + $0x1f8] sm:$0xff]  ;;  %3429 = vst [vmem:[#allocation27_spill] sm:$0xff] %v2437_v45  ;;  %v2442_v46 = vld [vmem:[%s3303_s2 + $0x1f0] sm:$0xff]  ;;  %p2134_p1 = scmp.lt.s32.totalorder %s1762_s27, %s1762_s27 }
  0x11   :  { %182 = vmatpush1.msra.mxu0 %v2393_v33  ;;  %215 = vmatprep.mubr.f32.mxu0 %v3312_v36  ;;  %v144_v37 = vrot.slane %v143_v35, 2  ;;  %3426 = vst [vmem:[#allocation24_spill] sm:$0xff] %v2418_v42  ;;  %v2425_v43 = vld [vmem:[%s3303_s2 + $0x78] sm:$0xff]  ;;  %3430 = vst [vmem:[#allocation28_spill] sm:$0xff] %v2442_v46  ;;  %v2449_v47 = vld [vmem:[%s3303_s2 + $0x70] sm:$0xff] }
  0x12   :  { %253 = vmatpush1.msra.mxu1 %v2400_v34  ;;  %286 = vmatprep.mubr.f32.mxu1 %v3312_v36  ;;  %3427 = vst [vmem:[#allocation25_spill] sm:$0xff] %v2425_v43  ;;  %v2430_v44 = vld [vmem:[%s3303_s2 + $0x178] sm:$0xff]  ;;  %3431 = vst [vmem:[#allocation29_spill] sm:$0xff] %v2449_v47  ;;  %v2454_v48 = vld [vmem:[%s3303_s2 + $0x170] sm:$0xff] }
  0x13   :  { %v145_v38 = vmax.f32 %v143_v35, %v144_v37  ;;  %1871 = vmatprep.subr.mxu0 %v2413_v41  ;;  %1927 = vmatprep.subr.mxu1 %v2418_v42  ;;  %3428 = vst [vmem:[#allocation26_spill] sm:$0xff] %v2430_v44  ;;  %3432 = vst [vmem:[#allocation30_spill] sm:$0xff] %v2454_v48  ;;  %v2461_v49 = vld [vmem:[%s3303_s2 + $0xe8] sm:$0xff]  ;;  %v2485_v53 = vld [vmem:[%s3303_s2 + $0xe0] sm:$0xff] }
  0x14   :  { %3433 = vst [vmem:[#allocation31_spill] sm:$0xff] %v2461_v49  ;;  %v2466_v50 = vld [vmem:[%s3303_s2 + $0x1e8] sm:$0xff]  ;;  %3437 = vst [vmem:[#allocation35_spill] sm:$0xff] %v2485_v53  ;;  %v2490_v54 = vld [vmem:[%s3303_s2 + $0x1e0] sm:$0xff] }
  0x15   :  { %v146_v39 = vrot.slane %v145_v38, 1  ;;  %3434 = vst [vmem:[#allocation32_spill] sm:$0xff] %v2466_v50  ;;  %v2473_v51 = vld [vmem:[%s3303_s2 + $0x68] sm:$0xff]  ;;  %3438 = vst [vmem:[#allocation36_spill] sm:$0xff] %v2490_v54  ;;  %v2497_v55 = vld [vmem:[%s3303_s2 + $0x60] sm:$0xff] }
  0x16   :  { %3435 = vst [vmem:[#allocation33_spill] sm:$0xff] %v2473_v51  ;;  %v2478_v52 = vld [vmem:[%s3303_s2 + $0x168] sm:$0xff]  ;;  %3439 = vst [vmem:[#allocation37_spill] sm:$0xff] %v2497_v55  ;;  %v2502_v56 = vld [vmem:[%s3303_s2 + $0x160] sm:$0xff] }
  0x17   :  { %v147_v40 = vmax.f32 %v145_v38, %v146_v39  ;;  %3436 = vst [vmem:[#allocation34_spill] sm:$0xff] %v2478_v52  ;;  %3440 = vst [vmem:[#allocation38_spill] sm:$0xff] %v2502_v56  ;;  %v2509_v57 = vld [vmem:[%s3303_s2 + $0xd8] sm:$0xff]  ;;  %v2533_v61 = vld [vmem:[%s3303_s2 + $0xd0] sm:$0xff] }
  0x18   :  { %3441 = vst [vmem:[#allocation39_spill] sm:$0xff] %v2509_v57  ;;  %v2514_v58 = vld [vmem:[%s3303_s2 + $0x1d8] sm:$0xff]  ;;  %3445 = vst [vmem:[#allocation43_spill] sm:$0xff] %v2533_v61  ;;  %v2538_v62 = vld [vmem:[%s3303_s2 + $0x1d0] sm:$0xff] }
  0x19   :  { %1769 = vmatmul.mubr.msk.f32.vlgmr.msra.gmra.mxu0 %vm140_vm0, %v147_v40  ;;  %1770 = vmatmul.mubr.msk.f32.vlgmr.msra.gmra.mxu1 %vm140_vm0, %v147_v40  ;;  %3442 = vst [vmem:[#allocation40_spill] sm:$0xff] %v2514_v58  ;;  %v2521_v59 = vld [vmem:[%s3303_s2 + $0x58] sm:$0xff]  ;;  %3446 = vst [vmem:[#allocation44_spill] sm:$0xff] %v2538_v62  ;;  %v2545_v63 = vld [vmem:[%s3303_s2 + $0x50] sm:$0xff] }
  0x1a   :  { %1872 = vmatpush3.msra.mxu0 %v2425_v43  ;;  %1928 = vmatpush3.msra.mxu1 %v2430_v44  ;;  %3443 = vst [vmem:[#allocation41_spill] sm:$0xff] %v2521_v59  ;;  %v2526_v60 = vld [vmem:[%s3303_s2 + $0x158] sm:$0xff]  ;;  %3447 = vst [vmem:[#allocation45_spill] sm:$0xff] %v2545_v63  ;;  %v2550_v26 = vld [vmem:[%s3303_s2 + $0x150] sm:$0xff] }
  0x1b   :  { %1873 = vmatprep.subr.mxu0 %v2437_v45  ;;  %1929 = vmatprep.subr.mxu1 %v2442_v46  ;;  %3444 = vst [vmem:[#allocation42_spill] sm:$0xff] %v2526_v60  ;;  %3448 = vst [vmem:[#allocation46_spill] sm:$0xff] %v2550_v26  ;;  %v2557_v29 = vld [vmem:[%s3303_s2 + $0xc8] sm:$0xff]  ;;  %v2581_v38 = vld [vmem:[%s3303_s2 + $0xc0] sm:$0xff] }
  0x1c   :  { %1874 = vmatpush3.msra.mxu0 %v2449_v47  ;;  %1930 = vmatpush3.msra.mxu1 %v2454_v48  ;;  %3449 = vst [vmem:[#allocation47_spill] sm:$0xff] %v2557_v29  ;;  %v2562_v32 = vld [vmem:[%s3303_s2 + $0x1c8] sm:$0xff]  ;;  %3453 = vst [vmem:[#allocation51_spill] sm:$0xff] %v2581_v38  ;;  %v2586_v39 = vld [vmem:[%s3303_s2 + $0x1c0] sm:$0xff] }
  0x1d   :  { %1875 = vmatprep.subr.mxu0 %v2461_v49  ;;  %1931 = vmatprep.subr.mxu1 %v2466_v50  ;;  %3450 = vst [vmem:[#allocation48_spill] sm:$0xff] %v2562_v32  ;;  %v2569_v35 = vld [vmem:[%s3303_s2 + $0x48] sm:$0xff]  ;;  %3454 = vst [vmem:[#allocation52_spill] sm:$0xff] %v2586_v39  ;;  %v2591_v40 = vld [vmem:[%s3303_s2 + $0x40] sm:$0xff] }
  0x1e   :  { %1876 = vmatpush3.msra.mxu0 %v2473_v51  ;;  %1932 = vmatpush3.msra.mxu1 %v2478_v52  ;;  %3451 = vst [vmem:[#allocation49_spill] sm:$0xff] %v2569_v35  ;;  %v2574_v37 = vld [vmem:[%s3303_s2 + $0x148] sm:$0xff]  ;;  %3455 = vst [vmem:[#allocation53_spill] sm:$0xff] %v2591_v40  ;;  %v2598_v36 = vld [vmem:[%s3303_s2 + $0x140] sm:$0xff] }
  0x1f   :  { %1877 = vmatprep.subr.mxu0 %v2485_v53  ;;  %1933 = vmatprep.subr.mxu1 %v2490_v54  ;;  %3452 = vst [vmem:[#allocation50_spill] sm:$0xff] %v2574_v37  ;;  %3456 = vst [vmem:[#allocation54_spill] sm:$0xff] %v2598_v36 }
  0x20   :  { %1878 = vmatpush3.msra.mxu0 %v2497_v55  ;;  %1934 = vmatpush3.msra.mxu1 %v2502_v56 }
  0x21   :  { %1879 = vmatprep.subr.mxu0 %v2509_v57  ;;  %1935 = vmatprep.subr.mxu1 %v2514_v58 }
  0x22   :  { %1880 = vmatpush3.msra.mxu0 %v2521_v59  ;;  %1936 = vmatpush3.msra.mxu1 %v2526_v60 }
  0x23   :  { %1881 = vmatprep.subr.mxu0 %v2533_v61  ;;  %1937 = vmatprep.subr.mxu1 %v2538_v62 }
  0x24   :  { %1882 = vmatpush3.msra.mxu0 %v2545_v63  ;;  %1938 = vmatpush3.msra.mxu1 %v2550_v26 }
  0x25   :  { %1883 = vmatprep.subr.mxu0 %v2557_v29  ;;  %1939 = vmatprep.subr.mxu1 %v2562_v32  ;;  %v2625_v32 = vld [vmem:[%s3303_s2 + $0xb0] sm:$0xff] }
  0x26   :  { %1884 = vmatpush3.msra.mxu0 %v2569_v35  ;;  %1940 = vmatpush3.msra.mxu1 %v2574_v37  ;;  %v2603_v37 = vld [vmem:[%s3303_s2 + $0xb8] sm:$0xff]  ;;  %3461 = vst [vmem:[#allocation59_spill] sm:$0xff] %v2625_v32  ;;  %v2642_v29 = vld [vmem:[%s3303_s2 + $0x130] sm:$0xff] }
  0x27   :  { %1885 = vmatprep.subr.mxu0 %v2581_v38  ;;  %1941 = vmatprep.subr.mxu1 %v2586_v39  ;;  %3457 = vst [vmem:[#allocation55_spill] sm:$0xff] %v2603_v37  ;;  %v2608_v35 = vld [vmem:[%s3303_s2 + $0x1b8] sm:$0xff]  ;;  %3464 = vst [vmem:[#allocation62_spill] sm:$0xff] %v2642_v29 }
  0x28   :  { %3458 = vst [vmem:[#allocation56_spill] sm:$0xff] %v2608_v35  ;;  %1886 = vmatpush3.msra.mxu0 %v2591_v40  ;;  %1942 = vmatpush3.msra.mxu1 %v2598_v36  ;;  %v2615_v39 = vld [vmem:[%s3303_s2 + $0x38] sm:$0xff]  ;;  %v2632_v36 = vld [vmem:[%s3303_s2 + $0x1b0] sm:$0xff] }
  0x29   :  { %3459 = vst [vmem:[#allocation57_spill] sm:$0xff] %v2615_v39  ;;  %v2620_v38 = vld [vmem:[%s3303_s2 + $0x138] sm:$0xff]  ;;  %1887 = vmatprep.subr.mxu0 %v2603_v37  ;;  %1943 = vmatprep.subr.mxu1 %v2608_v35  ;;  %3462 = vst [vmem:[#allocation60_spill] sm:$0xff] %v2632_v36  ;;  %v2637_v40 = vld [vmem:[%s3303_s2 + $0x30] sm:$0xff] }
  0x2a   :  { %3460 = vst [vmem:[#allocation58_spill] sm:$0xff] %v2620_v38  ;;  %3463 = vst [vmem:[#allocation61_spill] sm:$0xff] %v2637_v40  ;;  %1888 = vmatpush3.msra.mxu0 %v2615_v39  ;;  %1944 = vmatpush3.msra.mxu1 %v2620_v38  ;;  %v2649_v35 = vld [vmem:[%s3303_s2 + $0xa8] sm:$0xff] }
  0x2b   :  { %3465 = vst [vmem:[#allocation63_spill] sm:$0xff] %v2649_v35  ;;  %v2654_v37 = vld [vmem:[%s3303_s2 + $0x1a8] sm:$0xff]  ;;  %1889 = vmatprep.subr.mxu0 %v2625_v32  ;;  %1945 = vmatprep.subr.mxu1 %v2632_v36  ;;  %v2673_v32 = vld [vmem:[%s3303_s2 + $0xa0] sm:$0xff] }
  0x2c   :  { %3466 = vst [vmem:[#allocation64_spill] sm:$0xff] %v2654_v37  ;;  %v2661_v39 = vld [vmem:[%s3303_s2 + $0x28] sm:$0xff]  ;;  %1890 = vmatpush3.msra.mxu0 %v2637_v40  ;;  %1946 = vmatpush3.msra.mxu1 %v2642_v29  ;;  %3469 = vst [vmem:[#allocation67_spill] sm:$0xff] %v2673_v32  ;;  %v2678_v36 = vld [vmem:[%s3303_s2 + $0x1a0] sm:$0xff] }
  0x2d   :  { %3467 = vst [vmem:[#allocation65_spill] sm:$0xff] %v2661_v39  ;;  %v2666_v38 = vld [vmem:[%s3303_s2 + $0x128] sm:$0xff]  ;;  %3470 = vst [vmem:[#allocation68_spill] sm:$0xff] %v2678_v36  ;;  %1891 = vmatprep.subr.mxu0 %v2649_v35  ;;  %1947 = vmatprep.subr.mxu1 %v2654_v37  ;;  %v2685_v40 = vld [vmem:[%s3303_s2 + $0x20] sm:$0xff] }
  0x2e   :  { %3468 = vst [vmem:[#allocation66_spill] sm:$0xff] %v2666_v38  ;;  %3471 = vst [vmem:[#allocation69_spill] sm:$0xff] %v2685_v40  ;;  %v2690_v29 = vld [vmem:[%s3303_s2 + $0x120] sm:$0xff]  ;;  %1892 = vmatpush3.msra.mxu0 %v2661_v39  ;;  %1948 = vmatpush3.msra.mxu1 %v2666_v38  ;;  %v2697_v35 = vld [vmem:[%s3303_s2 + $0x98] sm:$0xff] }
  0x2f   :  { %3472 = vst [vmem:[#allocation70_spill] sm:$0xff] %v2690_v29  ;;  %3473 = vst [vmem:[#allocation71_spill] sm:$0xff] %v2697_v35  ;;  %v2702_v37 = vld [vmem:[%s3303_s2 + $0x198] sm:$0xff]  ;;  %1893 = vmatprep.subr.mxu0 %v2673_v32  ;;  %1949 = vmatprep.subr.mxu1 %v2678_v36  ;;  %v2721_v32 = vld [vmem:[%s3303_s2 + $0x90] sm:$0xff] }
  0x30   :  { %3474 = vst [vmem:[#allocation72_spill] sm:$0xff] %v2702_v37  ;;  %v2709_v39 = vld [vmem:[%s3303_s2 + $0x18] sm:$0xff]  ;;  %1894 = vmatpush3.msra.mxu0 %v2685_v40  ;;  %1950 = vmatpush3.msra.mxu1 %v2690_v29  ;;  %3477 = vst [vmem:[#allocation75_spill] sm:$0xff] %v2721_v32  ;;  %v2726_v36 = vld [vmem:[%s3303_s2 + $0x190] sm:$0xff] }
  0x31   :  { %3475 = vst [vmem:[#allocation73_spill] sm:$0xff] %v2709_v39  ;;  %v2714_v38 = vld [vmem:[%s3303_s2 + $0x118] sm:$0xff]  ;;  %3478 = vst [vmem:[#allocation76_spill] sm:$0xff] %v2726_v36  ;;  %1895 = vmatprep.subr.mxu0 %v2697_v35  ;;  %1951 = vmatprep.subr.mxu1 %v2702_v37  ;;  %v2733_v40 = vld [vmem:[%s3303_s2 + $0x10] sm:$0xff] }
  0x32   :  { %3476 = vst [vmem:[#allocation74_spill] sm:$0xff] %v2714_v38  ;;  %3479 = vst [vmem:[#allocation77_spill] sm:$0xff] %v2733_v40  ;;  %v2738_v29 = vld [vmem:[%s3303_s2 + $0x110] sm:$0xff]  ;;  %1896 = vmatpush3.msra.mxu0 %v2709_v39  ;;  %1952 = vmatpush3.msra.mxu1 %v2714_v38  ;;  %v2745_v35 = vld [vmem:[%s3303_s2 + $0x88] sm:$0xff] }
  0x33   :  { %3480 = vst [vmem:[#allocation78_spill] sm:$0xff] %v2738_v29  ;;  %3481 = vst [vmem:[#allocation79_spill] sm:$0xff] %v2745_v35  ;;  %v2750_v37 = vld [vmem:[%s3303_s2 + $0x188] sm:$0xff]  ;;  %1897 = vmatprep.subr.mxu0 %v2721_v32  ;;  %1953 = vmatprep.subr.mxu1 %v2726_v36  ;;  %v2769_v32 = vld [vmem:[%s3303_s2 + $0x80] sm:$0xff] }
  0x34   :  { %3482 = vst [vmem:[#allocation80_spill] sm:$0xff] %v2750_v37  ;;  %v2757_v39 = vld [vmem:[%s3303_s2 + $0x8] sm:$0xff]  ;;  %1898 = vmatpush3.msra.mxu0 %v2733_v40  ;;  %1954 = vmatpush3.msra.mxu1 %v2738_v29  ;;  %3485 = vst [vmem:[#allocation83_spill] sm:$0xff] %v2769_v32  ;;  %v2774_v36 = vld [vmem:[%s3303_s2 + $0x180] sm:$0xff] }
  0x35   :  { %3483 = vst [vmem:[#allocation81_spill] sm:$0xff] %v2757_v39  ;;  %v2762_v38 = vld [vmem:[%s3303_s2 + $0x108] sm:$0xff]  ;;  %3486 = vst [vmem:[#allocation84_spill] sm:$0xff] %v2774_v36  ;;  %1899 = vmatprep.subr.mxu0 %v2745_v35  ;;  %1955 = vmatprep.subr.mxu1 %v2750_v37  ;;  %v2781_v40 = vld [vmem:[%s3303_s2] sm:$0xff]  ;;  %v2152_v37 = vmov 1966171168  }
  0x36   :  { %3484 = vst [vmem:[#allocation82_spill] sm:$0xff] %v2762_v38  ;;  %3487 = vst [vmem:[#allocation85_spill] sm:$0xff] %v2781_v40  ;;  %1900 = vmatpush3.msra.mxu0 %v2757_v39  ;;  %1956 = vmatpush3.msra.mxu1 %v2762_v38  ;;  %v2790_v29 = vld [vmem:[%s3303_s2 + $0x100] sm:$0xff]  ;;  %v300_v35 = vunpack.c.l.s4 %v2152_v37  ;;  %v3361_v39 = vlaneseq }
  0x37   :  { %1901 = vmatprep.subr.mxu0 %v2769_v32  ;;  %1957 = vmatprep.subr.mxu1 %v2774_v36  ;;  %3488 = vst [vmem:[#allocation86_spill] sm:$0xff] %v2790_v29  ;;  %v134_v37 = vld [vmem:[%s3301_s0] sm:$0xf] }
  0x38   :  { %1902 = vmatpush3.msra.mxu0 %v2781_v40  ;;  %1958 = vmatpush3.msra.mxu1 %v2790_v29  ;;  %v301_v26 = vunpack.c.0.s8 %v300_v35  ;;  %v303_v38 = vshrl.u32 %v3361_v39, 7 }
  0x39   :  { %822 = vmatprep.subr.mxu1 %v2213_v0 }
  0x3a   :  { %v2796_v36 = vsub.s32 %v301_v26, %v303_v38  ;;  %v332_v26 = vsub.s32 1, %v303_v38  ;;  %v340_v56 = vsub.s32 3, %v303_v38  ;;  %v328_v55 = vsub.s32 0, %v303_v38 }
  0x3b   :  { %v336_v54 = vsub.s32 2, %v303_v38 }
  0x3c   :  { %3489 = vst [vmem:[#allocation87_spill] sm:$0xff] %v2796_v36 }
  0xd9   :  { %v217_v32 = vpop.f32.mrf.mxu0  ;;  %v288_v63 = vpop.f32.mrf.mxu1 }
  0xdb   :  { %v219_v62 = vpop.f32.mrf.mxu0  ;;  %v290_v61 = vpop.f32.mrf.mxu1 }
  0xdc   :  { %v297_v60 = vcombine.low %v217_v32, %v219_v62  ;;  %v298_v59 = vcombine.low %v288_v63, %v290_v61 }
  0xde   :  { %v305_v40 = vrot.slane %v297_v60, %v2796_v36  ;;  %v312_v29 = vrot.slane %v298_v59, %v2796_v36 }
  0xe0   :  { %v313_v58 = vcombine.low %v305_v40, %v312_v29 }
  0xe2   :  { %v320_v35 = vrot.slane %v313_v58, %v2796_v36 }
  0xe4   :  { %v322_v39 = vsub.f32 %v134_v37, %v320_v35 }
  0xe6   :  { %v323_v57 = vmul.f32 1.442695, %v322_v39 }
  0xe8   :  { %2103 = vpow2.f32 %v323_v57 }
  0xf5   :  { %v2104_v62 = vpop.eup %2103 }
  0xf6   :  { %v333_v61 = vrot.slane %v2104_v62, %v332_v26  ;;  %v341_v63 = vrot.slane %v2104_v62, %v340_v56  ;;  %v329_v60 = vrot.slane %v2104_v62, %v328_v55  ;;  %v337_v32 = vrot.slane %v2104_v62, %v336_v54 }
  0xf8   :  { %v2805_v59 = vmul.f32 %v333_v61, %v2381_v30  ;;  %v2808_v29 = vmul.f32 %v341_v63, %v2386_v31  ;;  %v2811_v58 = vmul.f32 %v329_v60, %v2393_v33  ;;  %v2814_v57 = vmul.f32 %v337_v32, %v2400_v34 }
  0xf9   :  { %v351_v39 = vmul.f32 %v333_v61, %v2353_v24  ;;  %v2818_v38 = vmul.f32 %v341_v63, %v2358_v25  ;;  %v350_v54 = vmul.f32 %v329_v60, %v2368_v27  ;;  %v2824_v55 = vmul.f32 %v329_v60, %v2223_v2 }
  0xfa   :  { %482 = vmatprep.mubr.f32.mxu0 %v2805_v59  ;;  %587 = vmatprep.mubr.f32.mxu1 %v2808_v29  ;;  %v2827_v56 = vmul.f32 %v333_v61, %v2213_v0  ;;  %v2832_v40 = vmul.f32 %v337_v32, %v2373_v28  ;;  %v2835_v37 = vmul.f32 %v341_v63, %v2334_v21 }
  0xfb   :  { %483 = vmatmul.mubr.f32.vlgmr.msra.gmra.mxu0 %v2811_v58  ;;  %588 = vmatmul.mubr.f32.vlgmr.msra.gmra.mxu1 %v2814_v57  ;;  %v2838_v35 = vmul.f32 %v329_v60, %v2269_v10  ;;  %v2842_v26 = vmul.f32 %v337_v32, %v2230_v3  ;;  %v2847_v36 = vmul.f32 %v333_v61, %v2257_v8 }
  0xfc   :  { %487 = vmatprep.mubr.f32.mxu0 %v351_v39  ;;  %592 = vmatprep.mubr.f32.mxu1 %v2818_v38  ;;  %v413_v62 = vadd.f32 %v2827_v56, %v2824_v55  ;;  %v2850_v53 = vmul.f32 %v341_v63, %v2218_v1  ;;  %v2853_v52 = vmul.f32 %v337_v32, %v2274_v11 }
  0xfd   :  { %v2856_v51 = vmul.f32 %v341_v63, %v2264_v9  ;;  %v355_v50 = vmul.f32 %v333_v61, %v2329_v20  ;;  %823 = vmatpush1.msra.mxu1 %v2223_v2  ;;  %v403_v48 = vadd.f32 %v2847_v36, %v2838_v35  ;;  %v354_v47 = vmul.f32 %v329_v60, %v2341_v22 }
  0xfe   :  { %v414_v49 = vadd.f32 %v413_v62, %v2842_v26  ;;  %v2865_v46 = vmul.f32 %v329_v60, %v2247_v6  ;;  %824 = vmatprep.subr.mxu1 %v2235_v4  ;;  %v356_v45 = vmul.f32 %v337_v32, %v2346_v23  ;;  %v361_v44 = vmul.f32 %v341_v63, %v2310_v17 }
  0xff   :  { %488 = vmatmul.mubr.f32.gmra.mxu0 %v350_v54  ;;  %593 = vmatmul.mubr.f32.gmra.mxu1 %v2832_v40  ;;  %v371_v43 = vmul.f32 %v333_v61, %v2235_v4  ;;  %v404_v42 = vadd.f32 %v403_v48, %v2853_v52  ;;  %v362_v41 = vmul.f32 %v329_v60, %v2293_v14 }
 0x100   :  { %597 = vmatprep.mubr.f32.mxu1 %v2835_v37  ;;  %v415_v62 = vadd.f32 %v414_v49, %v2850_v53  ;;  %492 = vmatprep.mubr.f32.mxu0 %v355_v50  ;;  %v372_v2 = vmul.f32 %v337_v32, %v2252_v7  ;;  %v373_v34 = vmul.f32 %v341_v63, %v2240_v5 }
 0x101   :  { %v408_v31 = vadd.f32 %v371_v43, %v2865_v46  ;;  %v363_v28 = vmul.f32 %v333_v61, %v2281_v12  ;;  %825 = vmatpush1.msra.mxu1 %v2247_v6  ;;  %v405_v4 = vadd.f32 %v404_v42, %v2856_v51  ;;  %v364_v49 = vmul.f32 %v337_v32, %v2298_v15 }
 0x102   :  { %416 = vadd.xlane.f32.xlu0 %v415_v62  ;;  %v359_v48 = vmul.f32 %v333_v61, %v2305_v16  ;;  %v358_v25 = vmul.f32 %v329_v60, %v2317_v18  ;;  %v388_v17 = vadd.f32 %v355_v50, %v354_v47  ;;  %v365_v11 = vmul.f32 %v341_v63, %v2286_v13 }
 0x103   :  { %493 = vmatmul.mubr.f32.gmra.mxu0 %v354_v47  ;;  %598 = vmatmul.mubr.f32.gmra.mxu1 %v356_v45  ;;  %v409_v23 = vadd.f32 %v408_v31, %v372_v2  ;;  %v398_v21 = vadd.f32 %v363_v28, %v362_v41  ;;  %v360_v6 = vmul.f32 %v337_v32, %v2322_v19 }
 0x104   :  { %406 = vadd.xlane.f32.xlu1 %v405_v4  ;;  %602 = vmatprep.mubr.f32.mxu1 %v361_v44  ;;  %v393_v62 = vadd.f32 %v359_v48, %v358_v25  ;;  %v383_v15 = vadd.f32 %v351_v39, %v350_v54  ;;  %v389_v47 = vadd.f32 %v388_v17, %v356_v45  ;;  %v649_v17 = vld [vmem:[%s3308_s7 + $0x8] sm:$0xff] }
 0x105   :  { %v410_v9 = vadd.f32 %v409_v23, %v373_v34  ;;  %v399_v42 = vadd.f32 %v398_v21, %v364_v49  ;;  %497 = vmatprep.mubr.f32.mxu0 %v359_v48  ;;  %826 = vmatprep.subr.mxu1 %v2257_v8  ;;  %v378_v4 = vadd.f32 %v2805_v59, %v2811_v58 }
 0x106   :  { %v394_v61 = vadd.f32 %v393_v62, %v360_v6  ;;  %827 = vmatpush1.msra.mxu1 %v2269_v10  ;;  %v384_v21 = vadd.f32 %v383_v15, %v2832_v40  ;;  %v390_v50 = vadd.f32 %v389_v47, %v2835_v37  ;;  %v3490_v15 = vmov 0.0  }
 0x107   :  { %411 = vadd.xlane.f32.xlu0 %v410_v9  ;;  %v400_v31 = vadd.f32 %v399_v42, %v365_v11  ;;  %498 = vmatmul.mubr.f32.gmra.mxu0 %v358_v25  ;;  %v379_v9 = vadd.f32 %v378_v4, %v2814_v57  ;;  %v2153_v25 = vmov 0  }
 0x108   :  { %603 = vmatmul.mubr.f32.gmra.mxu1 %v360_v6  ;;  %502 = vmatprep.mubr.f32.mxu0 %v363_v28  ;;  %v395_v23 = vadd.f32 %v394_v61, %v361_v44  ;;  %v385_v6 = vadd.f32 %v384_v21, %v2818_v38  ;;  %v648_v28 = vld [vmem:[%s3308_s7] sm:$0xff]  ;;  %v1579_v44 = vld [vmem:[%s3309_s8 + $0x18] sm:$0xff] }
 0x109   :  { %401 = vadd.xlane.f32.xlu1 %v400_v31  ;;  %607 = vmatprep.mubr.f32.mxu1 %v365_v11  ;;  %v380_v11 = vadd.f32 %v379_v9, %v2808_v29 }
 0x10a   :  { %828 = vmatprep.subr.mxu1 %v2281_v12  ;;  %2102 = vset.pattern.permute.xlu1 %v2153_v25 }
 0x10b   :  { %396 = vadd.xlane.f32.xlu0 %v395_v23  ;;  %503 = vmatmul.mubr.f32.gmra.mxu0 %v362_v41  ;;  %v1577_v41 = vld [vmem:[%s3309_s8 + $0x8] sm:$0xff] }
 0x10c   :  { %608 = vmatmul.mubr.f32.gmra.mxu1 %v364_v49  ;;  %507 = vmatprep.mubr.f32.mxu0 %v2847_v36  ;;  %v1576_v36 = vld [vmem:[%s3309_s8] sm:$0xff] }
 0x10d   :  { %391 = vadd.xlane.f32.xlu1 %v390_v50  ;;  %612 = vmatprep.mubr.f32.mxu1 %v2856_v51 }
 0x10e   :  { %829 = vmatpush1.msra.mxu1 %v2293_v14  ;;  %2101 = vset.pattern.permute.xlu0 %v2153_v25 }
 0x10f   :  { %386 = vadd.xlane.f32.xlu0 %v385_v6  ;;  %508 = vmatmul.mubr.f32.gmra.mxu0 %v2838_v35 }
 0x110   :  { %613 = vmatmul.mubr.f32.gmra.mxu1 %v2853_v52  ;;  %512 = vmatprep.mubr.f32.mxu0 %v371_v43  ;;  %v1578_v43 = vld [vmem:[%s3309_s8 + $0x10] sm:$0xff] }
 0x111   :  { %381 = vadd.xlane.f32.xlu1 %v380_v11  ;;  %617 = vmatprep.mubr.f32.mxu1 %v373_v34  ;;  %v651_v34 = vld [vmem:[%s3308_s7 + $0x18] sm:$0xff] }
 0x112   :  { %830 = vmatprep.subr.mxu1 %v2305_v16 }
 0x113   :  { %513 = vmatmul.mubr.f32.gmra.mxu0 %v2865_v46  ;;  %831 = vmatpush1.msra.mxu1 %v2317_v18 }
 0x114   :  { %618 = vmatmul.mubr.f32.gmra.mxu1 %v372_v2  ;;  %517 = vmatprep.mubr.f32.mxu0 %v2827_v56  ;;  %v644_v2 = vld [vmem:[%s3307_s6] sm:$0xff] }
 0x115   :  { %622 = vmatprep.mubr.f32.mxu1 %v2850_v53  ;;  %832 = vmatprep.subr.mxu1 %v2329_v20 }
 0x116   :  { %833 = vmatpush1.msra.mxu1 %v2341_v22 }
 0x117   :  { %518 = vmatmul.mubr.f32.gmra.mxu0 %v2824_v55  ;;  %834 = vmatprep.subr.mxu1 %v2353_v24 }
 0x118   :  { %623 = vmatmul.mubr.f32.gmra.mxu1 %v2842_v26  ;;  %2091 = vmatprep.mubr.msk.f32.mxu0 %vm672_vm1, %v644_v2 }
 0x119   :  { %835 = vmatpush1.msra.mxu1 %v2368_v27  ;;  %870 = vmatprep.mubr.f32.mxu1 %v3490_v15 }
 0x11a   :  { %836 = vmatprep.subr.mxu1 %v2381_v30 }
 0x11b   :  { %837 = vmatpush1.msra.mxu1 %v2393_v33 }
 0x11c   :  { %1012 = vmatprep.subr.mxu1 %v2213_v0  ;;  %v650_v0 = vld [vmem:[%s3308_s7 + $0x10] sm:$0xff] }
 0x122   :  { %659 = vperm.xlu1 %2102, %v649_v17  }
 0x125   :  { %654 = vperm.xlu0 %2101, %v648_v28  }
 0x126   :  { %664 = vperm.xlu1 %2102, %v650_v0  }
 0x12a   :  { %669 = vperm.xlu1 %2102, %v651_v34  }
 0x12e   :  { %1582 = vperm.xlu1 %2102, %v1576_v36  }
 0x132   :  { %1587 = vperm.xlu1 %2102, %v1577_v41  }
 0x136   :  { %1592 = vperm.xlu1 %2102, %v1578_v43  }
 0x13a   :  { %1597 = vperm.xlu1 %2102, %v1579_v44  }
 0x18b   :  { %v417_v55 = vpop.xlane.xlu0 %416 }
 0x18c   :  { %2105 = vrcp.f32 %v417_v55 }
 0x18d   :  { %v407_v61 = vpop.xlane.xlu1 %406 }
 0x190   :  { %v412_v48 = vpop.xlane.xlu0 %411 }
 0x191   :  { %2107 = vrcp.f32 %v412_v48 }
 0x192   :  { %2109 = vrcp.f32 %v407_v61  ;;  %v402_v9 = vpop.xlane.xlu1 %401 }
 0x193   :  { %2111 = vrcp.f32 %v402_v9  ;;  %v3493_v9 = vld [vmem:[#allocation11_spill] sm:$0xff] }
 0x194   :  { %v397_v34 = vpop.xlane.xlu0 %396 }
 0x195   :  { %2113 = vrcp.f32 %v397_v34 }
 0x196   :  { %v392_v61 = vpop.xlane.xlu1 %391 }
 0x197   :  { %2115 = vrcp.f32 %v392_v61 }
 0x199   :  { %v2106_v55 = vpop.eup %2105 }
 0x19e   :  { %v2108_v33 = vpop.eup %2107 }
 0x1bb   :  { %v2945_v45 = vpop.f32.mrf.mxu0  ;;  %v2947_v46 = vpop.f32.mrf.mxu1 }
 0x1bd   :  { %v2949_v51 = vpop.f32.mrf.mxu0  ;;  %v2951_v52 = vpop.f32.mrf.mxu1 }
 0x1bf   :  { %v2953_v53 = vpop.f32.mrf.mxu0  ;;  %v2955_v63 = vpop.f32.mrf.mxu1 }
 0x1c1   :  { %v2957_v60 = vpop.f32.mrf.mxu0  ;;  %v2959_v32 = vpop.f32.mrf.mxu1 }
 0x1c3   :  { %v2961_v59 = vpop.f32.mrf.mxu0  ;;  %v2963_v29 = vpop.f32.mrf.mxu1 }
 0x1c5   :  { %v2965_v58 = vpop.f32.mrf.mxu0  ;;  %v2967_v57 = vpop.f32.mrf.mxu1 }
 0x1c7   :  { %v1912_v39 = vpop.f32.mrf.mxu0 }
 0x1c8   :  { %v1968_v38 = vpop.f32.mrf.mxu1 }
 0x1c9   :  { %v1913_v54 = vpop.f32.mrf.mxu0 }
 0x1ca   :  { %v1969_v56 = vpop.f32.mrf.mxu1 }
 0x1cb   :  { %v1915_v40 = vpop.f32.mrf.mxu0 }
 0x1cc   :  { %v1971_v37 = vpop.f32.mrf.mxu1 }
 0x1cd   :  { %v1916_v35 = vpop.f32.mrf.mxu0 }
 0x1ce   :  { %v1972_v26 = vpop.f32.mrf.mxu1  ;;  %v1917_v30 = vadd.f32 %v1916_v35, %v1915_v40  ;;  %v1967_v35 = vadd.f32 %v2967_v57, %v2963_v29  ;;  %v1905_v29 = vadd.f32 %v2949_v51, %v2945_v45  ;;  %v645_v45 = vld [vmem:[%s3307_s6 + $0x8] sm:$0xff]  ;;  %v647_v51 = vld [vmem:[%s3307_s6 + $0x18] sm:$0xff] }
 0x1cf   :  { %v1918_v49 = vpop.f32.mrf.mxu0  ;;  %v1973_v27 = vadd.f32 %v1972_v26, %v1971_v37  ;;  %v1911_v37 = vadd.f32 %v2965_v58, %v2961_v59  ;;  %v1961_v58 = vadd.f32 %v2951_v52, %v2947_v46  ;;  %v646_v46 = vld [vmem:[%s3307_s6 + $0x10] sm:$0xff]  ;;  %v3491_v52 = vld [vmem:[#allocation9_spill] sm:$0xff] }
 0x1d0   :  { %v1974_v62 = vpop.f32.mrf.mxu1 }
 0x1d1   :  { %v1919_v42 = vpop.f32.mrf.mxu0 }
 0x1d2   :  { %v1975_v31 = vpop.f32.mrf.mxu1  ;;  %v1920_v36 = vadd.f32 %v1919_v42, %v1918_v49  ;;  %v2110_v49 = vpop.eup %2109  ;;  %v1914_v42 = vadd.f32 %v1913_v54, %v1912_v39  ;;  %v600_v39 = vadd.f32 %v1967_v35, %v1911_v37  ;;  %v3517_v37 = vld [vmem:[#allocation32_spill] sm:$0xff]  ;;  %v3518_v35 = vld [vmem:[#allocation33_spill] sm:$0xff] }
 0x1d3   :  { %v1921_v47 = vpop.f32.mrf.mxu0  ;;  %v1976_v41 = vadd.f32 %v1975_v31, %v1974_v62  ;;  %v387_v62 = vpop.xlane.xlu0 %386  ;;  %v1970_v31 = vadd.f32 %v1969_v56, %v1968_v38 }
 0x1d4   :  { %v1977_v4 = vpop.f32.mrf.mxu1  ;;  %2117 = vrcp.f32 %v387_v62  ;;  %v2112_v40 = vpop.eup %2111  ;;  %v137_v62 = vld [vmem:[%s3304_s3 + $0x8] sm:$0xff] }
 0x1d5   :  { %v1922_v23 = vpop.f32.mrf.mxu0  ;;  %v615_v24 = vadd.f32 %v1976_v41, %v1920_v36  ;;  %v605_v26 = vadd.f32 %v1970_v31, %v1914_v42  ;;  %v3512_v42 = vld [vmem:[#allocation27_spill] sm:$0xff]  ;;  %v3513_v31 = vld [vmem:[#allocation28_spill] sm:$0xff] }
 0x1d6   :  { %v1978_v21 = vpop.f32.mrf.mxu1  ;;  %v1923_v11 = vadd.f32 %v1922_v23, %v1921_v47 }
 0x1d7   :  { %v1924_v50 = vpop.f32.mrf.mxu0  ;;  %v1979_v2 = vadd.f32 %v1978_v21, %v1977_v4  ;;  %v610_v4 = vadd.f32 %v1973_v27, %v1917_v30  ;;  %v639_v23 = vmul.f32 %v2110_v49, %v615_v24  ;;  %v2114_v24 = vpop.eup %2113  ;;  %v1908_v27 = vadd.f32 %v2957_v60, %v2953_v53  ;;  %v3511_v49 = vld [vmem:[#allocation26_spill] sm:$0xff] }
 0x1d8   :  { %v1980_v6 = vpop.f32.mrf.mxu1  ;;  %v1964_v30 = vadd.f32 %v2959_v32, %v2955_v63  ;;  %v635_v38 = vmul.f32 %v2114_v24, %v605_v26  ;;  %v2116_v59 = vpop.eup %2115  ;;  %v590_v63 = vadd.f32 %v1961_v58, %v1905_v29  ;;  %v3519_v26 = vld [vmem:[#allocation34_spill] sm:$0xff]  ;;  %v3520_v24 = vld [vmem:[#allocation35_spill] sm:$0xff]  ;;  %v3525_v29 = vld [vmem:[#allocation40_spill] sm:$0xff] }
 0x1d9   :  { %v1925_v17 = vpop.f32.mrf.mxu0  ;;  %v620_v43 = vadd.f32 %v1979_v2, %v1923_v11  ;;  %v637_v21 = vmul.f32 %v2112_v40, %v610_v4  ;;  %v633_v54 = vmul.f32 %v2116_v59, %v600_v39  ;;  %v3495_v11 = vld [vmem:[#allocation13_spill] sm:$0xff]  ;;  %v3496_v2 = vld [vmem:[#allocation14_spill] sm:$0xff]  ;;  %v655_v36 = vpop.permute.xlu0 %654  ;;  %v138_v40 = vld [vmem:[%s3304_s3 + $0x10] sm:$0xff] }
 0x1da   :  { %v1926_v25 = vadd.f32 %v1925_v17, %v1924_v50  ;;  %v1981_v28 = vpop.f32.mrf.mxu1  ;;  %v595_v57 = vadd.f32 %v1964_v30, %v1908_v27  ;;  %v3492_v50 = vld [vmem:[#allocation10_spill] sm:$0xff]  ;;  %v3497_v17 = vld [vmem:[#allocation16_spill] sm:$0xff]  ;;  %v3514_v4 = vld [vmem:[#allocation29_spill] sm:$0xff] }
 0x1db   :  { %v1982_v0 = vadd.f32 %v1981_v28, %v1980_v6  ;;  %v641_v47 = vmul.f32 %v2108_v33, %v620_v43  ;;  %v382_v33 = vpop.xlane.xlu1 %381  ;;  %v3494_v6 = vld [vmem:[#allocation12_spill] sm:$0xff]  ;;  %v1174_v30 = vld [vmem:[%s3306_s5] sm:$0xff]  ;;  %v3524_v59 = vld [vmem:[#allocation39_spill] sm:$0xff] }
 0x1dc   :  { %2119 = vrcp.f32 %v382_v33  ;;  %v3499_v28 = vld [vmem:[#allocation20_spill] sm:$0xff]  ;;  %v3516_v33 = vld [vmem:[#allocation31_spill] sm:$0xff]  ;;  %v3522_v39 = vld [vmem:[#allocation37_spill] sm:$0xff] }
 0x1dd   :  { %v625_v44 = vadd.f32 %v1982_v0, %v1926_v25  ;;  %v3498_v25 = vld [vmem:[#allocation18_spill] sm:$0xff]  ;;  %v3521_v27 = vld [vmem:[#allocation36_spill] sm:$0xff] }
 0x1de   :  { %v3500_v0 = vld [vmem:[#allocation22_spill] sm:$0xff] }
 0x1df   :  { %v643_v48 = vmul.f32 %v2106_v55, %v625_v44  ;;  %v3501_v44 = vld [vmem:[#allocation6_spill] sm:$0xff]  ;;  %v3502_v55 = vld [vmem:[#allocation7_spill] sm:$0xff] }
 0x1e0   :  { %v3527_v58 = vld [vmem:[#allocation42_spill] sm:$0xff] }
 0x1e1   :  { %2075 = vmatprep.subr.msk.mxu0 %vm672_vm1, %v643_v48  ;;  %v2118_v53 = vpop.eup %2117 }
 0x1e2   :  { %2076 = vmatpush3.xpose.msk.msra.mxu0 %vm672_vm1, %v643_v48  ;;  %v631_v60 = vmul.f32 %v2118_v53, %v595_v57  ;;  %v660_v48 = vpop.permute.xlu1 %659  ;;  %v3528_v57 = vld [vmem:[#allocation43_spill] sm:$0xff]  ;;  %v3530_v53 = vld [vmem:[#allocation45_spill] sm:$0xff] }
 0x1e3   :  { %2077 = vmatprep.subr.msk.mxu0 %vm672_vm1, %v641_v47 }
 0x1e6   :  { %2078 = vmatpush3.xpose.msk.msra.mxu0 %vm672_vm1, %v641_v47  ;;  %v3503_v47 = vld [vmem:[#allocation8_spill] sm:$0xff] }
 0x1e7   :  { %2079 = vmatprep.subr.msk.mxu0 %vm672_vm1, %v639_v23 }
 0x1e9   :  { %v2120_v32 = vpop.eup %2119 }
 0x1ea   :  { %2080 = vmatpush3.xpose.msk.msra.mxu0 %vm672_vm1, %v639_v23  ;;  %v629_v56 = vmul.f32 %v2120_v32, %v590_v63  ;;  %v3515_v23 = vld [vmem:[#allocation30_spill] sm:$0xff]  ;;  %v3533_v32 = vld [vmem:[#allocation48_spill] sm:$0xff] }
 0x1eb   :  { %2081 = vmatprep.subr.msk.mxu0 %vm672_vm1, %v637_v21  ;;  %v3531_v63 = vld [vmem:[#allocation46_spill] sm:$0xff] }
 0x1ee   :  { %2082 = vmatpush3.xpose.msk.msra.mxu0 %vm672_vm1, %v637_v21  ;;  %v139_v21 = vld [vmem:[%s3304_s3 + $0x18] sm:$0xff] }
 0x1ef   :  { %2083 = vmatprep.subr.msk.mxu0 %vm672_vm1, %v635_v38 }
 0x1f2   :  { %2084 = vmatpush3.xpose.msk.msra.mxu0 %vm672_vm1, %v635_v38  ;;  %v3523_v38 = vld [vmem:[#allocation38_spill] sm:$0xff] }
 0x1f3   :  { %2085 = vmatprep.subr.msk.mxu0 %vm672_vm1, %v633_v54 }
 0x1f6   :  { %2086 = vmatpush3.xpose.msk.msra.mxu0 %vm672_vm1, %v633_v54  ;;  %v3529_v54 = vld [vmem:[#allocation44_spill] sm:$0xff] }
 0x1f7   :  { %2087 = vmatprep.subr.msk.mxu0 %vm672_vm1, %v631_v60 }
 0x1fa   :  { %2088 = vmatpush3.xpose.msk.msra.mxu0 %vm672_vm1, %v631_v60  ;;  %v3532_v60 = vld [vmem:[#allocation47_spill] sm:$0xff] }
 0x1fb   :  { %2089 = vmatprep.subr.msk.mxu0 %vm672_vm1, %v629_v56 }
 0x1fe   :  { %2090 = vmatpush3.xpose.msk.msra.mxu0 %vm672_vm1, %v629_v56  ;;  %v3534_v56 = vld [vmem:[#allocation49_spill] sm:$0xff] }
 0x1ff   :  { %911 = vmatprep.subr.mxu0 %v2218_v1 }
 0x201   :  { %2092 = vmatmul.mubr.msk.f32.vlgmr.msra.gmra.mxu0 %vm672_vm1, %v645_v45  ;;  %v3535_v45 = vld [vmem:[#allocation50_spill] sm:$0xff] }
 0x202   :  { %2094 = vmatprep.mubr.msk.f32.mxu0 %vm672_vm1, %v646_v46  ;;  %912 = vmatpush1.msra.mxu0 %v2230_v3  ;;  %v3536_v46 = vld [vmem:[#allocation51_spill] sm:$0xff] }
 0x203   :  { %913 = vmatprep.subr.mxu0 %v2240_v5 }
 0x204   :  { %914 = vmatpush1.msra.mxu0 %v2252_v7 }
 0x205   :  { %2095 = vmatmul.mubr.msk.f32.gmra.mxu0 %vm672_vm1, %v647_v51  ;;  %915 = vmatprep.subr.mxu0 %v3491_v52  ;;  %v3537_v51 = vld [vmem:[#allocation52_spill] sm:$0xff] }
 0x206   :  { %916 = vmatpush1.msra.mxu0 %v3492_v50  ;;  %959 = vmatprep.mubr.f32.mxu0 %v3490_v15 }
 0x207   :  { %917 = vmatprep.subr.mxu0 %v2286_v13 }
 0x208   :  { %918 = vmatpush1.msra.mxu0 %v3493_v9 }
 0x209   :  { %919 = vmatprep.subr.mxu0 %v3494_v6 }
 0x20a   :  { %920 = vmatpush1.msra.mxu0 %v2322_v19 }
 0x20b   :  { %921 = vmatprep.subr.mxu0 %v3495_v11 }
 0x20c   :  { %922 = vmatpush1.msra.mxu0 %v3496_v2 }
 0x20d   :  { %923 = vmatprep.subr.mxu0 %v3497_v17 }
 0x20e   :  { %924 = vmatpush1.msra.mxu0 %v3498_v25 }
 0x20f   :  { %925 = vmatprep.subr.mxu0 %v3499_v28 }
 0x210   :  { %926 = vmatpush1.msra.mxu0 %v3500_v0 }
 0x211   :  { %1101 = vmatprep.subr.mxu0 %v2218_v1 }
 0x2c1   :  { %v2093_v34 = vpop.f32.mrf.mxu0 }
 0x2c2   :  { %v781_v1 = vadd.f32 %v2093_v34, %v660_v48  ;;  %v3548_v34 = vld [vmem:[#allocation63_spill] sm:$0xff]  ;;  %v3554_v48 = vld [vmem:[#allocation69_spill] sm:$0xff] }
 0x2c3   :  { %v775_v41 = vpop.f32.mrf.mxu0 }
 0x2c4   :  { %v776_v43 = vadd.f32 %v775_v41, %v655_v36  ;;  %v3549_v36 = vld [vmem:[#allocation64_spill] sm:$0xff]  ;;  %v3550_v41 = vld [vmem:[#allocation65_spill] sm:$0xff] }
 0x2c5   :  { %v2096_v61 = vpop.f32.mrf.mxu0 }
 0x2c6   :  { %1783 = vmatmul.mubr.msk.f32.vlgmr.msra.gmra.mxu1 %vm140_vm0, %v776_v43  ;;  %1787 = vmatmul.mubr.msk.f32.vlgmr.msra.gmra.mxu0 %vm140_vm0, %v776_v43  ;;  %v3551_v43 = vld [vmem:[#allocation66_spill] sm:$0xff] }
 0x2c7   :  { %1013 = vmatpush1.msra.mxu1 %v3501_v44  ;;  %1102 = vmatpush1.msra.mxu0 %v2230_v3  ;;  %v785_v3 = vpop.f32.mrf.mxu0  ;;  %v3552_v44 = vld [vmem:[#allocation67_spill] sm:$0xff] }
 0x2c8   :  { %1014 = vmatprep.subr.mxu1 %v3502_v55  ;;  %1103 = vmatprep.subr.mxu0 %v2240_v5  ;;  %v665_v5 = vpop.permute.xlu1 %664  ;;  %v3553_v55 = vld [vmem:[#allocation68_spill] sm:$0xff] }
 0x2c9   :  { %1015 = vmatpush1.msra.mxu1 %v3503_v47  ;;  %1104 = vmatpush1.msra.mxu0 %v2252_v7  ;;  %v786_v7 = vadd.f32 %v785_v3, %v665_v5  ;;  %v3556_v47 = vld [vmem:[#allocation71_spill] sm:$0xff]  ;;  %v3558_v3 = vld [vmem:[#allocation73_spill] sm:$0xff]  ;;  %v3559_v5 = vld [vmem:[#allocation74_spill] sm:$0xff] }
 0x2ca   :  { %876 = vmatprep.mubr.f32.mxu1 %v3490_v15  ;;  %965 = vmatprep.mubr.f32.mxu0 %v3490_v15 }
 0x2cb   :  { %1016 = vmatprep.subr.mxu1 %v2257_v8  ;;  %1105 = vmatprep.subr.mxu0 %v3491_v52  ;;  %v3538_v52 = vld [vmem:[#allocation53_spill] sm:$0xff] }
 0x2cc   :  { %1784 = vmatmul.mubr.msk.f32.gmra.mxu1 %vm140_vm0, %v781_v1  ;;  %1788 = vmatmul.mubr.msk.f32.gmra.mxu0 %vm140_vm0, %v781_v1  ;;  %v670_v8 = vpop.permute.xlu1 %669  ;;  %v3557_v1 = vld [vmem:[#allocation72_spill] sm:$0xff] }
 0x2cd   :  { %1017 = vmatpush1.msra.mxu1 %v2269_v10  ;;  %1106 = vmatpush1.msra.mxu0 %v3492_v50  ;;  %v791_v10 = vadd.f32 %v2096_v61, %v670_v8  ;;  %v3539_v50 = vld [vmem:[#allocation54_spill] sm:$0xff]  ;;  %v3561_v8 = vld [vmem:[#allocation76_spill] sm:$0xff] }
 0x2ce   :  { %1018 = vmatprep.subr.mxu1 %v2281_v12  ;;  %1107 = vmatprep.subr.mxu0 %v2286_v13  ;;  %v3504_v12 = vld [vmem:[#allocation15_spill] sm:$0xff]  ;;  %v3505_v13 = vld [vmem:[#allocation17_spill] sm:$0xff]  ;;  %v3555_v61 = vld [vmem:[#allocation70_spill] sm:$0xff] }
 0x2cf   :  { %1019 = vmatpush1.msra.mxu1 %v2293_v14  ;;  %1108 = vmatpush1.msra.mxu0 %v3493_v9  ;;  %v3506_v14 = vld [vmem:[#allocation19_spill] sm:$0xff] }
 0x2d0   :  { %882 = vmatprep.mubr.f32.mxu1 %v3490_v15  ;;  %971 = vmatprep.mubr.f32.mxu0 %v3490_v15  ;;  %v3540_v9 = vld [vmem:[#allocation55_spill] sm:$0xff] }
 0x2d1   :  { %1020 = vmatprep.subr.mxu1 %v2305_v16  ;;  %1109 = vmatprep.subr.mxu0 %v3494_v6  ;;  %v3507_v16 = vld [vmem:[#allocation21_spill] sm:$0xff]  ;;  %v3541_v6 = vld [vmem:[#allocation56_spill] sm:$0xff] }
 0x2d2   :  { %1785 = vmatmul.mubr.msk.f32.gmra.mxu1 %vm140_vm0, %v786_v7  ;;  %1789 = vmatmul.mubr.msk.f32.gmra.mxu0 %vm140_vm0, %v786_v7  ;;  %v3560_v7 = vld [vmem:[#allocation75_spill] sm:$0xff] }
 0x2d3   :  { %1021 = vmatpush1.msra.mxu1 %v2317_v18  ;;  %1110 = vmatpush1.msra.mxu0 %v2322_v19  ;;  %v136_v18 = vld [vmem:[%s3304_s3] sm:$0xff]  ;;  %v3508_v19 = vld [vmem:[#allocation23_spill] sm:$0xff] }
 0x2d4   :  { %1022 = vmatprep.subr.mxu1 %v2329_v20  ;;  %1111 = vmatprep.subr.mxu0 %v3495_v11  ;;  %v3509_v20 = vld [vmem:[#allocation24_spill] sm:$0xff]  ;;  %v3542_v11 = vld [vmem:[#allocation57_spill] sm:$0xff] }
 0x2d5   :  { %1023 = vmatpush1.msra.mxu1 %v2341_v22  ;;  %1112 = vmatpush1.msra.mxu0 %v3496_v2  ;;  %v3510_v22 = vld [vmem:[#allocation25_spill] sm:$0xff]  ;;  %v3543_v2 = vld [vmem:[#allocation58_spill] sm:$0xff] }
 0x2d6   :  { %888 = vmatprep.mubr.f32.mxu1 %v3490_v15  ;;  %977 = vmatprep.mubr.f32.mxu0 %v3490_v15 }
 0x2d7   :  { %1024 = vmatprep.subr.mxu1 %v3504_v12  ;;  %1113 = vmatprep.subr.mxu0 %v3497_v17  ;;  %v3544_v17 = vld [vmem:[#allocation59_spill] sm:$0xff]  ;;  %v3563_v12 = vld [vmem:[#allocation78_spill] sm:$0xff] }
 0x2d8   :  { %1786 = vmatmul.mubr.msk.f32.gmra.mxu1 %vm140_vm0, %v791_v10  ;;  %1790 = vmatmul.mubr.msk.f32.gmra.mxu0 %vm140_vm0, %v791_v10  ;;  %v3562_v10 = vld [vmem:[#allocation77_spill] sm:$0xff] }
 0x2d9   :  { %1025 = vmatpush1.msra.mxu1 %v3505_v13  ;;  %1114 = vmatpush1.msra.mxu0 %v3498_v25  ;;  %v3545_v25 = vld [vmem:[#allocation60_spill] sm:$0xff]  ;;  %v3564_v13 = vld [vmem:[#allocation79_spill] sm:$0xff] }
 0x2da   :  { %1026 = vmatprep.subr.mxu1 %v3506_v14  ;;  %1115 = vmatprep.subr.mxu0 %v3499_v28  ;;  %v3546_v28 = vld [vmem:[#allocation61_spill] sm:$0xff]  ;;  %v3565_v14 = vld [vmem:[#allocation80_spill] sm:$0xff] }
 0x2db   :  { %1027 = vmatpush1.msra.mxu1 %v3507_v16  ;;  %1116 = vmatpush1.msra.mxu0 %v3500_v0  ;;  %v3547_v0 = vld [vmem:[#allocation62_spill] sm:$0xff]  ;;  %v3566_v16 = vld [vmem:[#allocation81_spill] sm:$0xff] }
 0x2dc   :  { %1060 = vmatprep.mubr.f32.mxu1 %v3490_v15  ;;  %1149 = vmatprep.mubr.f32.mxu0 %v3490_v15 }
 0x2dd   :  { %1995 = vmatprep.subr.msk.mxu1 %vm672_vm1, %v3508_v19  ;;  %2035 = vmatprep.subr.msk.mxu0 %vm672_vm1, %v3509_v20  ;;  %v3568_v19 = vld [vmem:[#allocation83_spill] sm:$0xff]  ;;  %v3569_v20 = vld [vmem:[#allocation84_spill] sm:$0xff] }
 0x2de   :  { %1791 = vmatmul.mubr.msk.f32.vlgmr.msra.gmra.mxu1 %vm140_vm0, %v136_v18  ;;  %1795 = vmatmul.mubr.msk.f32.vlgmr.msra.gmra.mxu0 %vm140_vm0, %v136_v18  ;;  %v3567_v18 = vld [vmem:[#allocation82_spill] sm:$0xff] }
 0x2df   :  { %1996 = vmatpush3.xpose.msk.msra.mxu1 %vm672_vm1, %v3510_v22  ;;  %2036 = vmatpush3.xpose.msk.msra.mxu0 %vm672_vm1, %v3511_v49  ;;  %v3570_v22 = vld [vmem:[#allocation85_spill] sm:$0xff]  ;;  %v3571_v49 = vld [vmem:[#allocation86_spill] sm:$0xff] }
 0x2e0   :  { %1997 = vmatprep.subr.msk.mxu1 %vm672_vm1, %v3512_v42  ;;  %2037 = vmatprep.subr.msk.mxu0 %vm672_vm1, %v3513_v31  ;;  %v1176_v42 = vld [vmem:[%s3306_s5 + $0x10] sm:$0xff]  ;;  %v1177_v31 = vld [vmem:[%s3306_s5 + $0x18] sm:$0xff] }
 0x2e1   :  { %1066 = vmatprep.mubr.f32.mxu1 %v3490_v15  ;;  %1155 = vmatprep.mubr.f32.mxu0 %v3490_v15 }
 0x2e2   :  { %1792 = vmatmul.mubr.msk.f32.gmra.mxu1 %vm140_vm0, %v137_v62  ;;  %1796 = vmatmul.mubr.msk.f32.gmra.mxu0 %vm140_vm0, %v137_v62  ;;  %v1175_v62 = vld [vmem:[%s3306_s5 + $0x8] sm:$0xff] }
 0x2e3   :  { %1998 = vmatpush3.xpose.msk.msra.mxu1 %vm672_vm1, %v3514_v4  ;;  %2038 = vmatpush3.xpose.msk.msra.mxu0 %vm672_vm1, %v3515_v23 }
 0x2e4   :  { %1999 = vmatprep.subr.msk.mxu1 %vm672_vm1, %v3516_v33  ;;  %2039 = vmatprep.subr.msk.mxu0 %vm672_vm1, %v3517_v37 }
 0x2e5   :  { %1072 = vmatprep.mubr.f32.mxu1 %v3490_v15  ;;  %1161 = vmatprep.mubr.f32.mxu0 %v3490_v15 }
 0x2e6   :  { %1793 = vmatmul.mubr.msk.f32.gmra.mxu1 %vm140_vm0, %v138_v40  ;;  %1797 = vmatmul.mubr.msk.f32.gmra.mxu0 %vm140_vm0, %v138_v40 }
 0x2e7   :  { %2000 = vmatpush3.xpose.msk.msra.mxu1 %vm672_vm1, %v3518_v35  ;;  %2040 = vmatpush3.xpose.msk.msra.mxu0 %vm672_vm1, %v3519_v26 }
 0x2e8   :  { %2001 = vmatprep.subr.msk.mxu1 %vm672_vm1, %v3520_v24  ;;  %2041 = vmatprep.subr.msk.mxu0 %vm672_vm1, %v3521_v27 }
 0x2e9   :  { %1078 = vmatprep.mubr.f32.mxu1 %v3490_v15  ;;  %1167 = vmatprep.mubr.f32.mxu0 %v3490_v15  ;;  %v3526_v15 = vld [vmem:[#allocation41_spill] sm:$0xff] }
 0x2ea   :  { %1794 = vmatmul.mubr.msk.f32.gmra.mxu1 %vm140_vm0, %v139_v21  ;;  %1798 = vmatmul.mubr.msk.f32.gmra.mxu0 %vm140_vm0, %v139_v21 }
 0x2eb   :  { %2002 = vmatpush3.xpose.msk.msra.mxu1 %vm672_vm1, %v3522_v39  ;;  %2042 = vmatpush3.xpose.msk.msra.mxu0 %vm672_vm1, %v3523_v38 }
 0x2ec   :  { %2003 = vmatprep.subr.msk.mxu1 %vm672_vm1, %v3524_v59  ;;  %2043 = vmatprep.subr.msk.mxu0 %vm672_vm1, %v3525_v29 }
 0x2ed   :  { %2027 = vmatprep.mubr.msk.f32.mxu1 %vm672_vm1, %v1174_v30  ;;  %2067 = vmatprep.mubr.msk.f32.mxu0 %vm672_vm1, %v1174_v30 }
 0x2ef   :  { %2004 = vmatpush3.xpose.msk.msra.mxu1 %vm672_vm1, %v3526_v15  ;;  %2044 = vmatpush3.xpose.msk.msra.mxu0 %vm672_vm1, %v3527_v58 }
 0x2f0   :  { %2005 = vmatprep.subr.msk.mxu1 %vm672_vm1, %v3528_v57  ;;  %2045 = vmatprep.subr.msk.mxu0 %vm672_vm1, %v3529_v54 }
 0x2f3   :  { %2006 = vmatpush3.xpose.msk.msra.mxu1 %vm672_vm1, %v3530_v53  ;;  %2046 = vmatpush3.xpose.msk.msra.mxu0 %vm672_vm1, %v3531_v63 }
 0x2f4   :  { %2007 = vmatprep.subr.msk.mxu1 %vm672_vm1, %v3532_v60  ;;  %2047 = vmatprep.subr.msk.mxu0 %vm672_vm1, %v3533_v32 }
 0x2f7   :  { %2008 = vmatpush3.xpose.msk.msra.mxu1 %vm672_vm1, %v3534_v56  ;;  %2048 = vmatpush3.xpose.msk.msra.mxu0 %vm672_vm1, %v3535_v45 }
 0x2f8   :  { %2009 = vmatprep.subr.msk.mxu1 %vm672_vm1, %v3536_v46  ;;  %2049 = vmatprep.subr.msk.mxu0 %vm672_vm1, %v3537_v51 }
 0x2fb   :  { %2010 = vmatpush3.xpose.msk.msra.mxu1 %vm672_vm1, %v3538_v52  ;;  %2050 = vmatpush3.xpose.msk.msra.mxu0 %vm672_vm1, %v3539_v50 }
 0x2fc   :  { %2011 = vmatprep.subr.msk.mxu1 %vm672_vm1, %v3540_v9  ;;  %2051 = vmatprep.subr.msk.mxu0 %vm672_vm1, %v3541_v6 }
 0x2ff   :  { %2012 = vmatpush3.xpose.msk.msra.mxu1 %vm672_vm1, %v3542_v11  ;;  %2052 = vmatpush3.xpose.msk.msra.mxu0 %vm672_vm1, %v3543_v2 }
 0x300   :  { %2013 = vmatprep.subr.msk.mxu1 %vm672_vm1, %v3544_v17  ;;  %2053 = vmatprep.subr.msk.mxu0 %vm672_vm1, %v3545_v25 }
 0x303   :  { %2014 = vmatpush3.xpose.msk.msra.mxu1 %vm672_vm1, %v3546_v28  ;;  %2054 = vmatpush3.xpose.msk.msra.mxu0 %vm672_vm1, %v3547_v0 }
 0x304   :  { %2015 = vmatprep.subr.msk.mxu1 %vm672_vm1, %v3548_v34  ;;  %2055 = vmatprep.subr.msk.mxu0 %vm672_vm1, %v3549_v36 }
 0x307   :  { %2016 = vmatpush3.xpose.msk.msra.mxu1 %vm672_vm1, %v3550_v41  ;;  %2056 = vmatpush3.xpose.msk.msra.mxu0 %vm672_vm1, %v3551_v43  ;;  %v1583_v43 = vpop.permute.xlu1 %1582 }
 0x308   :  { %2017 = vmatprep.subr.msk.mxu1 %vm672_vm1, %v3552_v44  ;;  %2057 = vmatprep.subr.msk.mxu0 %vm672_vm1, %v3553_v55 }
 0x30b   :  { %2018 = vmatpush3.xpose.msk.msra.mxu1 %vm672_vm1, %v3554_v48  ;;  %2058 = vmatpush3.xpose.msk.msra.mxu0 %vm672_vm1, %v3555_v61 }
 0x30c   :  { %2019 = vmatprep.subr.msk.mxu1 %vm672_vm1, %v3556_v47  ;;  %2059 = vmatprep.subr.msk.mxu0 %vm672_vm1, %v3557_v1 }
 0x30f   :  { %2020 = vmatpush3.xpose.msk.msra.mxu1 %vm672_vm1, %v3558_v3  ;;  %2060 = vmatpush3.xpose.msk.msra.mxu0 %vm672_vm1, %v3559_v5 }
 0x310   :  { %2021 = vmatprep.subr.msk.mxu1 %vm672_vm1, %v3560_v7  ;;  %2061 = vmatprep.subr.msk.mxu0 %vm672_vm1, %v3561_v8 }
 0x313   :  { %2022 = vmatpush3.xpose.msk.msra.mxu1 %vm672_vm1, %v3562_v10  ;;  %2062 = vmatpush3.xpose.msk.msra.mxu0 %vm672_vm1, %v3563_v12 }
 0x314   :  { %2023 = vmatprep.subr.msk.mxu1 %vm672_vm1, %v3564_v13  ;;  %2063 = vmatprep.subr.msk.mxu0 %vm672_vm1, %v3565_v14 }
 0x317   :  { %2024 = vmatpush3.xpose.msk.msra.mxu1 %vm672_vm1, %v3566_v16  ;;  %2064 = vmatpush3.xpose.msk.msra.mxu0 %vm672_vm1, %v3567_v18 }
 0x318   :  { %2025 = vmatprep.subr.msk.mxu1 %vm672_vm1, %v3568_v19  ;;  %2065 = vmatprep.subr.msk.mxu0 %vm672_vm1, %v3569_v20 }
 0x31b   :  { %2026 = vmatpush3.xpose.msk.msra.mxu1 %vm672_vm1, %v3570_v22  ;;  %2066 = vmatpush3.xpose.msk.msra.mxu0 %vm672_vm1, %v3571_v49 }
 0x31e   :  { %2028 = vmatmul.mubr.msk.f32.vlgmr.msra.gmra.mxu1 %vm672_vm1, %v1174_v30  ;;  %2068 = vmatmul.mubr.msk.f32.vlgmr.msra.gmra.mxu0 %vm672_vm1, %v1174_v30 }
 0x31f   :  { %2029 = vmatprep.mubr.msk.f32.mxu1 %vm672_vm1, %v1175_v62  ;;  %2069 = vmatprep.mubr.msk.f32.mxu0 %vm672_vm1, %v1175_v62 }
 0x322   :  { %2030 = vmatmul.mubr.msk.f32.gmra.mxu1 %vm672_vm1, %v1175_v62  ;;  %2070 = vmatmul.mubr.msk.f32.gmra.mxu0 %vm672_vm1, %v1175_v62  ;;  %v1588_v62 = vpop.permute.xlu1 %1587 }
 0x323   :  { %2031 = vmatprep.mubr.msk.f32.mxu1 %vm672_vm1, %v1176_v42  ;;  %2071 = vmatprep.mubr.msk.f32.mxu0 %vm672_vm1, %v1176_v42 }
 0x326   :  { %2032 = vmatmul.mubr.msk.f32.gmra.mxu1 %vm672_vm1, %v1176_v42  ;;  %2072 = vmatmul.mubr.msk.f32.gmra.mxu0 %vm672_vm1, %v1176_v42 }
 0x327   :  { %2033 = vmatprep.mubr.msk.f32.mxu1 %vm672_vm1, %v1177_v31  ;;  %2073 = vmatprep.mubr.msk.f32.mxu0 %vm672_vm1, %v1177_v31 }
 0x32a   :  { %2034 = vmatmul.mubr.msk.f32.gmra.mxu1 %vm672_vm1, %v1177_v31  ;;  %2074 = vmatmul.mubr.msk.f32.gmra.mxu0 %vm672_vm1, %v1177_v31 }
 0x386   :  { %v872_v4 = vpop.f32.mrf.mxu1  ;;  %v961_v23 = vpop.f32.mrf.mxu0 }
 0x388   :  { %v874_v40 = vpop.f32.mrf.mxu1  ;;  %v963_v33 = vpop.f32.mrf.mxu0 }
 0x38c   :  { %v878_v37 = vpop.f32.mrf.mxu1  ;;  %v967_v35 = vpop.f32.mrf.mxu0 }
 0x38e   :  { %v880_v26 = vpop.f32.mrf.mxu1  ;;  %v969_v21 = vpop.f32.mrf.mxu0 }
 0x392   :  { %v884_v24 = vpop.f32.mrf.mxu1  ;;  %v973_v27 = vpop.f32.mrf.mxu0 }
 0x394   :  { %v3255_v30 = vpop.f32.mrf.mxu1  ;;  %v3257_v39 = vpop.f32.mrf.mxu0 }
 0x398   :  { %v3259_v38 = vpop.f32.mrf.mxu1  ;;  %v3261_v59 = vpop.f32.mrf.mxu0 }
 0x39a   :  { %v3263_v29 = vpop.f32.mrf.mxu1  ;;  %v3265_v15 = vpop.f32.mrf.mxu0 }
 0x39e   :  { %v1062_v58 = vpop.f32.mrf.mxu1  ;;  %v1151_v57 = vpop.f32.mrf.mxu0 }
 0x3a0   :  { %v1064_v54 = vpop.f32.mrf.mxu1  ;;  %v1153_v53 = vpop.f32.mrf.mxu0 }
 0x3a2   :  { %v1068_v63 = vpop.f32.mrf.mxu1  ;;  %v1157_v60 = vpop.f32.mrf.mxu0 }
 0x3a4   :  { %v1070_v32 = vpop.f32.mrf.mxu1  ;;  %v1159_v56 = vpop.f32.mrf.mxu0 }
 0x3a6   :  { %v1074_v45 = vpop.f32.mrf.mxu1  ;;  %v1163_v46 = vpop.f32.mrf.mxu0 }
 0x3a8   :  { %v3267_v51 = vpop.f32.mrf.mxu1  ;;  %v3269_v52 = vpop.f32.mrf.mxu0 }
 0x3aa   :  { %v3271_v50 = vpop.f32.mrf.mxu1  ;;  %v3273_v9 = vpop.f32.mrf.mxu0 }
 0x3ac   :  { %v3275_v6 = vpop.f32.mrf.mxu1  ;;  %v3277_v11 = vpop.f32.mrf.mxu0 }
 0x3de   :  { %v1448_v2 = vpop.f32.mrf.mxu1  ;;  %v1537_v17 = vpop.f32.mrf.mxu0 }
 0x3df   :  { %v1449_v0 = vadd.f32 %v1448_v2, %v872_v4  ;;  %v1538_v34 = vadd.f32 %v1537_v17, %v961_v23 }
 0x3e0   :  { %v1450_v25 = vpop.f32.mrf.mxu1  ;;  %v1539_v28 = vpop.f32.mrf.mxu0 }
 0x3e1   :  { %v1451_v44 = vadd.f32 %v1450_v25, %v874_v40  ;;  %v1540_v55 = vadd.f32 %v1539_v28, %v963_v33  ;;  %v1560_v3 = vmul.f32 %v1449_v0, %v1062_v58  ;;  %v1562_v5 = vmul.f32 %v1538_v34, %v1151_v57 }
 0x3e2   :  { %v1454_v36 = vpop.f32.mrf.mxu1  ;;  %v1543_v41 = vpop.f32.mrf.mxu0 }
 0x3e3   :  { %v1455_v48 = vadd.f32 %v1454_v36, %v878_v37  ;;  %v1544_v61 = vadd.f32 %v1543_v41, %v967_v35  ;;  %v1561_v10 = vmul.f32 %v1451_v44, %v1064_v54  ;;  %v1563_v12 = vmul.f32 %v1540_v55, %v1153_v53  ;;  %v1593_v44 = vpop.permute.xlu1 %1592 }
 0x3e4   :  { %v1456_v47 = vpop.f32.mrf.mxu1  ;;  %v1545_v1 = vpop.f32.mrf.mxu0  ;;  %v1600_v42 = vmul.f32 %v1583_v43, %v1560_v3  ;;  %v1652_v31 = vmul.f32 %v1560_v3, %v1560_v3  ;;  %v1602_v4 = vmul.f32 %v1583_v43, %v1562_v5  ;;  %v1654_v23 = vmul.f32 %v1562_v5, %v1562_v5 }
 0x3e5   :  { %v1457_v13 = vadd.f32 %v1456_v47, %v880_v26  ;;  %v1564_v14 = vmul.f32 %v1455_v48, %v1068_v63  ;;  %v1566_v16 = vmul.f32 %v1544_v61, %v1157_v60  ;;  %v1546_v18 = vadd.f32 %v1545_v1, %v969_v21 }
 0x3e6   :  { %v1460_v7 = vpop.f32.mrf.mxu1  ;;  %v1549_v8 = vpop.f32.mrf.mxu0  ;;  %v1601_v40 = vmul.f32 %v1583_v43, %v1561_v10  ;;  %v1653_v33 = vmul.f32 %v1561_v10, %v1561_v10  ;;  %v1603_v37 = vmul.f32 %v1583_v43, %v1563_v12  ;;  %v1655_v54 = vmul.f32 %v1563_v12, %v1563_v12 }
 0x3e7   :  { %v1461_v22 = vadd.f32 %v1460_v7, %v884_v24  ;;  %v1550_v49 = vadd.f32 %v1549_v8, %v973_v27  ;;  %v1565_v35 = vmul.f32 %v1457_v13, %v1070_v32  ;;  %v1656_v26 = vmul.f32 %v1564_v14, %v1564_v14 }
 0x3e8   :  { %v1462_v19 = vpop.f32.mrf.mxu1  ;;  %v1551_v20 = vpop.f32.mrf.mxu0  ;;  %v1658_v53 = vmul.f32 %v1566_v16, %v1566_v16  ;;  %v1567_v63 = vmul.f32 %v1546_v18, %v1159_v56  ;;  %v1604_v2 = vmul.f32 %v1588_v62, %v1564_v14  ;;  %v1606_v17 = vmul.f32 %v1588_v62, %v1566_v16 }
 0x3e9   :  { %v1568_v21 = vmul.f32 %v1461_v22, %v1074_v45  ;;  %v1570_v60 = vmul.f32 %v1550_v49, %v1163_v46  ;;  %v1463_v24 = vadd.f32 %v1462_v19, %v3255_v30  ;;  %v1552_v27 = vadd.f32 %v1551_v20, %v3257_v39  ;;  %v1598_v16 = vpop.permute.xlu1 %1597 }
 0x3ea   :  { %v1466_v58 = vpop.f32.mrf.mxu1  ;;  %v1555_v57 = vpop.f32.mrf.mxu0  ;;  %v1605_v0 = vmul.f32 %v1588_v62, %v1565_v35  ;;  %v1657_v32 = vmul.f32 %v1565_v35, %v1565_v35  ;;  %v1668_v46 = vadd.f32 %v1656_v26, %v1652_v31  ;;  %v1686_v55 = vadd.f32 %v1658_v53, %v1654_v23 }
 0x3eb   :  { %v1467_v25 = vadd.f32 %v1466_v58, %v3259_v38  ;;  %v1556_v28 = vadd.f32 %v1555_v57, %v3261_v59  ;;  %v1660_v34 = vmul.f32 %v1568_v21, %v1568_v21  ;;  %v1662_v36 = vmul.f32 %v1570_v60, %v1570_v60 }
 0x3ec   :  { %v1468_v41 = vpop.f32.mrf.mxu1  ;;  %v1557_v43 = vpop.f32.mrf.mxu0  ;;  %v1569_v56 = vmul.f32 %v1463_v24, %v3267_v51  ;;  %v1571_v45 = vmul.f32 %v1552_v27, %v3269_v52  ;;  %v1607_v38 = vmul.f32 %v1588_v62, %v1567_v63  ;;  %v1659_v48 = vmul.f32 %v1567_v63, %v1567_v63 }
 0x3ed   :  { %v1572_v30 = vmul.f32 %v1467_v25, %v3271_v50  ;;  %v1574_v39 = vmul.f32 %v1556_v28, %v3273_v9  ;;  %v1616_v59 = vadd.f32 %v1604_v2, %v1600_v42  ;;  %v1634_v61 = vadd.f32 %v1606_v17, %v1602_v4 }
 0x3ee   :  { %v1469_v47 = vadd.f32 %v1468_v41, %v3263_v29  ;;  %v1558_v1 = vadd.f32 %v1557_v43, %v3265_v15  ;;  %v1669_v3 = vadd.f32 %v1668_v46, %v1660_v34  ;;  %v1687_v5 = vadd.f32 %v1686_v55, %v1662_v36 }
 0x3ef   :  { %v1664_v7 = vmul.f32 %v1572_v30, %v1572_v30  ;;  %v1666_v51 = vmul.f32 %v1574_v39, %v1574_v39  ;;  %v1625_v8 = vadd.f32 %v1605_v0, %v1601_v40  ;;  %v1677_v52 = vadd.f32 %v1657_v32, %v1653_v33 }
 0x3f0   :  { %v1661_v10 = vmul.f32 %v1569_v56, %v1569_v56  ;;  %v1663_v50 = vmul.f32 %v1571_v45, %v1571_v45  ;;  %v1643_v12 = vadd.f32 %v1607_v38, %v1603_v37  ;;  %v1695_v9 = vadd.f32 %v1659_v48, %v1655_v54 }
 0x3f1   :  { %v1670_v13 = vadd.f32 %v1669_v3, %v1664_v7  ;;  %v1688_v14 = vadd.f32 %v1687_v5, %v1666_v51  ;;  %v1608_v18 = vmul.f32 %v1593_v44, %v1568_v21  ;;  %v1610_v19 = vmul.f32 %v1593_v44, %v1570_v60 }
 0x3f2   :  { %v1573_v20 = vmul.f32 %v1469_v47, %v3275_v6  ;;  %v1575_v29 = vmul.f32 %v1558_v1, %v3277_v11  ;;  %v1609_v15 = vmul.f32 %v1593_v44, %v1569_v56  ;;  %v1612_v22 = vmul.f32 %v1598_v16, %v1572_v30 }
 0x3f3   :  { %v1671_v49 = vrot.slane %v1670_v13, 4  ;;  %v1689_v62 = vrot.slane %v1688_v14, 4  ;;  %v1678_v42 = vadd.f32 %v1677_v52, %v1661_v10  ;;  %v1696_v31 = vadd.f32 %v1695_v9, %v1663_v50 }
 0x3f4   :  { %v1665_v4 = vmul.f32 %v1573_v20, %v1573_v20  ;;  %v1667_v23 = vmul.f32 %v1575_v29, %v1575_v29  ;;  %v1611_v40 = vmul.f32 %v1593_v44, %v1571_v45  ;;  %v1614_v37 = vmul.f32 %v1598_v16, %v1574_v39 }
 0x3f5   :  { %v1672_v33 = vadd.f32 %v1671_v49, %v1670_v13  ;;  %v1690_v35 = vadd.f32 %v1689_v62, %v1688_v14  ;;  %v1617_v58 = vadd.f32 %v1616_v59, %v1608_v18  ;;  %v1613_v57 = vmul.f32 %v1598_v16, %v1573_v20 }
 0x3f6   :  { %v1679_v54 = vadd.f32 %v1678_v42, %v1665_v4  ;;  %v1697_v26 = vadd.f32 %v1696_v31, %v1667_v23  ;;  %v1635_v53 = vadd.f32 %v1634_v61, %v1610_v19  ;;  %v1615_v11 = vmul.f32 %v1598_v16, %v1575_v29 }
 0x3f7   :  { %v1673_v6 = vrot.slane %v1672_v33, 2  ;;  %v1691_v63 = vrot.slane %v1690_v35, 2  ;;  %v1626_v21 = vadd.f32 %v1625_v8, %v1609_v15  ;;  %v1618_v60 = vadd.f32 %v1617_v58, %v1612_v22 }
 0x3f8   :  { %v1680_v24 = vrot.slane %v1679_v54, 4  ;;  %v1698_v27 = vrot.slane %v1697_v26, 4  ;;  %v1644_v2 = vadd.f32 %v1643_v12, %v1611_v40  ;;  %v1636_v25 = vadd.f32 %v1635_v53, %v1614_v37 }
 0x3f9   :  { %v1674_v17 = vadd.f32 %v1673_v6, %v1672_v33  ;;  %v1692_v28 = vadd.f32 %v1691_v63, %v1690_v35  ;;  %v1627_v0 = vadd.f32 %v1626_v21, %v1613_v57  ;;  %v1619_v44 = vrot.slane %v1618_v60, 4 }
 0x3fa   :  { %v1681_v32 = vadd.f32 %v1680_v24, %v1679_v54  ;;  %v1699_v34 = vadd.f32 %v1698_v27, %v1697_v26  ;;  %v1645_v43 = vadd.f32 %v1644_v2, %v1615_v11  ;;  %v1637_v39 = vrot.slane %v1636_v25, 4  ;;  %v3572_v27 = vld [vmem:[#allocation87_spill] sm:$0xff] }
 0x3fb   :  { %v1675_v36 = vrot.slane %v1674_v17, 1  ;;  %v1693_v41 = vrot.slane %v1692_v28, 1  ;;  %v1628_v55 = vrot.slane %v1627_v0, 4  ;;  %v1620_v1 = vadd.f32 %v1619_v44, %v1618_v60 }
 0x3fc   :  { %v1682_v56 = vrot.slane %v1681_v32, 2  ;;  %v1700_v45 = vrot.slane %v1699_v34, 2  ;;  %v1646_v47 = vrot.slane %v1645_v43, 4  ;;  %v1638_v7 = vadd.f32 %v1637_v39, %v1636_v25 }
 0x3fd   :  { %v1676_v30 = vadd.f32 %v1675_v36, %v1674_v17  ;;  %v1694_v46 = vadd.f32 %v1693_v41, %v1692_v28  ;;  %v1629_v51 = vadd.f32 %v1628_v55, %v1627_v0  ;;  %v1621_v50 = vrot.slane %v1620_v1, 2 }
 0x3fe   :  { %v1683_v38 = vadd.f32 %v1682_v56, %v1681_v32  ;;  %v1701_v48 = vadd.f32 %v1700_v45, %v1699_v34  ;;  %v1647_v52 = vadd.f32 %v1646_v47, %v1645_v43  ;;  %v1639_v9 = vrot.slane %v1638_v7, 2 }
 0x3ff   :  { %v1704_v59 = vmax.f32 %v1676_v30, 1e-24  ;;  %v1706_v61 = vmax.f32 %v1694_v46, 1e-24  ;;  %v1630_v14 = vrot.slane %v1629_v51, 2  ;;  %v1622_v18 = vadd.f32 %v1621_v50, %v1620_v1 }
 0x400   :  { %v1684_v3 = vrot.slane %v1683_v38, 1  ;;  %v1702_v5 = vrot.slane %v1701_v48, 1  ;;  %v1648_v16 = vrot.slane %v1647_v52, 2  ;;  %v1640_v19 = vadd.f32 %v1639_v9, %v1638_v7 }
 0x401   :  { %2121 = vrsqrt.f32 %v1704_v59  ;;  %v1631_v20 = vadd.f32 %v1630_v14, %v1629_v51  ;;  %v1623_v15 = vrot.slane %v1622_v18, 1  ;;  %v1716_v57 = vstv %s3310_s9  ;;  %s2129_s9 = scalar_lea.vmem %s1762_s27, 64 }
 0x402   :  { %v1685_v8 = vadd.f32 %v1684_v3, %v1683_v38  ;;  %2123 = vrsqrt.f32 %v1706_v61  ;;  %v1703_v10 = vadd.f32 %v1702_v5, %v1701_v48  ;;  %v1649_v29 = vadd.f32 %v1648_v16, %v1647_v52  ;;  %p2130_p0 = scmp.ne.s32.totalorder %s1762_s27, %s2129_s9  ;;  %p2135_p2 = scmp.lt.s32.totalorder %s2129_s9, %s2129_s9 }
 0x403   :  { %v1641_v22 = vrot.slane %v1640_v19, 1  ;;  %v1632_v49 = vrot.slane %v1631_v20, 1  ;;  %v1624_v4 = vadd.f32 %v1623_v15, %v1622_v18  ;;  %v3573_v28 = vlaneseq }
 0x404   :  { %v1705_v12 = vmax.f32 %v1685_v8, 1e-24  ;;  %v1707_v13 = vmax.f32 %v1703_v10, 1e-24  ;;  %v1650_v42 = vrot.slane %v1649_v29, 1  ;;  %p2136_p3 = por %p2135_p2, %p2134_p1 }
 0x405   :  { %v1642_v23 = vadd.f32 %v1641_v22, %v1640_v19  ;;  %v1633_v40 = vadd.f32 %v1632_v49, %v1631_v20  ;;  %vm1752_vm2 = vcmp.lt.s32.totalorder %v3573_v28, 512 }
 0x406   :  { %2125 = vrsqrt.f32 %v1705_v12  ;;  %v1651_v35 = vadd.f32 %v1650_v42, %v1649_v29  ;;  %p2137_p4 = pnand %p2136_p3, %p2130_p0 }
 0x407   :  { %2127 = vrsqrt.f32 %v1707_v13 }
 0x40e   :  { %v2122_v62 = vpop.eup %2121 }
 0x40f   :  { %v2124_v31 = vpop.eup %2123  ;;  %v1712_v33 = vmul.f32 %v2122_v62, %v1624_v4 }
 0x410   :  { %v1714_v58 = vmul.f32 %v2124_v31, %v1642_v23 }
 0x411   :  { %v1717_v6 = vadd.f32 %v1716_v57, %v1712_v33 }
 0x412   :  { %v1719_v11 = vadd.f32 %v1716_v57, %v1714_v58 }
 0x413   :  { %v2126_v37 = vpop.eup %2125 }
 0x414   :  { %v2128_v54 = vpop.eup %2127  ;;  %v1713_v26 = vmul.f32 %v2126_v37, %v1633_v40 }
 0x415   :  { %v1715_v53 = vmul.f32 %v2128_v54, %v1651_v35 }
 0x416   :  { %v1718_v63 = vadd.f32 %v1716_v57, %v1713_v26 }
 0x417   :  { %v1720_v21 = vadd.f32 %v1716_v57, %v1715_v53 }
 0x418   :  { %v1725_v60 = vcombine.low %v1717_v6, %v1718_v63 }
 0x419   :  { %v1726_v24 = vcombine.low %v1719_v11, %v1720_v21 }
 0x41a   :  { %v1733_v2 = vrot.slane %v1725_v60, %v3572_v27 }
 0x41b   :  { %v1740_v17 = vrot.slane %v1726_v24, %v3572_v27 }
 0x41d   :  { %v1741_v25 = vcombine.low %v1733_v2, %v1740_v17 }
 0x41f   :  { %v1748_v0 = vrot.slane %v1741_v25, %v3572_v27 }
 0x421   :  { %1754 = vst.msk [vmem:[#allocation3] sm:$0xf] %vm1752_vm2, %v1748_v0 }
 0x422   :  { %2140 = shalt.err (!%p2137_p4)
}
 0x423   :  { %1764 = dma.vmem_to_hbm [thread:$0]  %s1762_s27, 64, %s3311_s10, [#allocation4]  }
 0x424   :  { %2149 = dma.done.wait [#allocation4], 64  }
 0x425   :  { %2150 = vsyncadd [#allocation4], 4294967232 }
 0x426   :  { %1768 = vsyncpa [#allocation4], 1 }

</bundles_post_ra>
